<compile_context>
chip_gen: v6e
topology: v6e:2x2x1
jax: 0.10.0
libtpu: 0.0.40
codegen_flags: <defaults>
</compile_context>

<pallas_src>
import functools

import jax
import jax.numpy as jnp
from jax.experimental import pallas as pl
from jax.experimental.pallas import tpu as pltpu

IN_FEAT = 3
HIDDEN = 128          # hidden_num=128 in the module
OUT_FEAT = 4
TM_MAX = 2048         # max rows per grid step (sweepable)
TM_MIN = 256


def _mlp_kernel(x_ref,            # (TM, 3)            f32       VMEM
                w1_ref, b1_ref,   # (3, 128), (1, 128) f32       VMEM
                wh_ref, bh_ref,   # (3,128,128) f32/bf16, (3,1,128) f32
                w5t_ref, b5_ref,  # (4, 128), (1, 4)   f32 (scale pre-folded)
                out_ref):         # (TM, 4)            f32       VMEM
    cdt = wh_ref.dtype            # compute dtype of the hidden MXU matmuls

    x = x_ref[...]                # (TM, 3)

    # Layer 1 (3 -> 128) on the VPU: a K=3 MXU pass is almost pure padding,
    # and the MXU slot is the saturated unit; VPU has slack.
    h = (x[:, 0:1] * w1_ref[0:1, :]
         + x[:, 1:2] * w1_ref[1:2, :]
         + x[:, 2:3] * w1_ref[2:3, :]
         + b1_ref[...])
    h = jnp.maximum(h, 0.0)

    # Hidden layers 2-4 (128 -> 128): MXU, optionally bf16 operands, f32 acc.
    for j in range(3):
        h = jnp.maximum(
            jnp.dot(h.astype(cdt), wh_ref[j],
                    preferred_element_type=jnp.float32) + bh_ref[j],
            0.0)

    # Final layer (128 -> 4) on VPU + XLU: per output column, broadcast-multiply
    # by the (1,128) weight row and cross-lane reduce. Avoids an MXU pass whose
    # N-width would be 97% wasted. output_range already folded into w5t/b5.
    for c in range(OUT_FEAT):
        col = jnp.sum(h * w5t_ref[c:c + 1, :], axis=-1, keepdims=True)  # (TM,1)
        out_ref[:, c:c + 1] = col + b5_ref[:, c:c + 1]


def init_params(key):
    """Deterministic synthetic weights (Kaiming-normal style, like 'relu' init)."""
    dims = [(IN_FEAT, HIDDEN), (HIDDEN, HIDDEN), (HIDDEN, HIDDEN),
            (HIDDEN, HIDDEN), (HIDDEN, OUT_FEAT)]
    params = []
    for (fan_in, fan_out) in dims:
        key, kw, kb = jax.random.split(key, 3)
        std = (2.0 / fan_in) ** 0.5
        w = std * jax.random.normal(kw, (fan_in, fan_out), jnp.float32)
        bound = 1.0 / (fan_in ** 0.5)
        b = jax.random.uniform(kb, (1, fan_out), jnp.float32, -bound, bound)
        params += [w, b]
    return params


def _choose_tm(n):
    """Largest tile <= TM_MAX that still gives >=2 grid steps when possible.

    Keeps the 'parallel' grid axis shardable across v7x's two TensorCores and
    avoids padding tiny inputs up to a full 2048-row tile.
    """
    tm = TM_MAX
    while tm > TM_MIN and n <= tm:
        tm //= 2
    return tm


@functools.partial(jax.jit, static_argnames=("use_bf16",))
def deformed_implicit_field_forward(coords, params, output_range, use_bf16=False):
    """coords: [N, 3] f32  ->  (deformation [N, 3], correction [N, 1])"""
    n = coords.shape[0]
    tm = _choose_tm(n)
    n_pad = pl.cdiv(n, tm) * tm
    x = jnp.pad(coords.astype(jnp.float32), ((0, n_pad - n), (0, 0)))

    w1, b1, w2, b2, w3, b3, w4, b4, w5, b5 = params
    scale = jnp.asarray(output_range, jnp.float32)

    # Fold output scaling into the final layer; transpose so each output column
    # is a (1, 128) broadcast row for the in-kernel VPU/XLU projection.
    w5t = (w5 * scale).T                     # (4, 128)
    b5s = b5 * scale                         # (1, 4)

    # Stack the three hidden-hidden layers into single resident operands.
    wh = jnp.stack([w2, w3, w4])             # (3, H, H)
    bh = jnp.stack([b2, b3, b4])             # (3, 1, H)

    cdt = jnp.bfloat16 if use_bf16 else jnp.float32
    whc = wh.astype(cdt)

    def const_spec(a):
        nd = a.ndim
        return pl.BlockSpec(a.shape, lambda i, nd=nd: (0,) * nd)

    weight_bytes = sum(int(a.size) * a.dtype.itemsize
                       for a in (w1, b1, whc, bh, w5t, b5s))
    cost = pl.CostEstimate(
        flops=2 * n_pad * (IN_FEAT * HIDDEN + 3 * HIDDEN * HIDDEN
                           + HIDDEN * OUT_FEAT),
        transcendentals=0,
        bytes_accessed=n_pad * 4 * (IN_FEAT + OUT_FEAT) + weight_bytes)

    grid = (n_pad // tm,)
    out = pl.pallas_call(
        _mlp_kernel,
        out_shape=jax.ShapeDtypeStruct((n_pad, OUT_FEAT), jnp.float32),
        grid=grid,
        in_specs=[
            pl.BlockSpec((tm, IN_FEAT), lambda i: (i, 0)),   # coords tile
            const_spec(w1), const_spec(b1),
            const_spec(whc), const_spec(bh),
            const_spec(w5t), const_spec(b5s),
        ],
        out_specs=pl.BlockSpec((tm, OUT_FEAT), lambda i: (i, 0)),
        compiler_params=pltpu.CompilerParams(
            dimension_semantics=("parallel",),
            vmem_limit_bytes=48 * 1024 * 1024),
        cost_estimate=cost,
    )(x, w1, b1, whc, bh, w5t, b5s)

    model_output = out[:n]
    deformation = model_output[:, :3]
    correction = model_output[:, 3:]
    return deformation, correction


def _reference(coords, params, output_range):
    w1, b1, w2, b2, w3, b3, w4, b4, w5, b5 = params
    dot = functools.partial(jnp.dot, precision=jax.lax.Precision.HIGHEST)
    h = jnp.maximum(dot(coords, w1) + b1, 0.0)
    h = jnp.maximum(dot(h, w2) + b2, 0.0)
    h = jnp.maximum(dot(h, w3) + b3, 0.0)
    h = jnp.maximum(dot(h, w4) + b4, 0.0)
    y = (dot(h, w5) + b5) * output_range
    return y[:, :3], y[:, 3:]


if __name__ == "__main__":
    key = jax.random.PRNGKey(0)
    k_params, k_coords = jax.random.split(key)

    params = init_params(k_params)

    # Small example input: 300 3-D points (exercises row padding and a 2-step grid).
    coords = jax.random.uniform(k_coords, (300, IN_FEAT), jnp.float32, -1.0, 1.0)

    # range_shape.max() from the module; deterministic synthetic range_shape.
    range_shape = jnp.array([1.5, 0.8, 2.0], jnp.float32)
    output_range = jnp.max(range_shape)

    ref_def, ref_cor = _reference(coords, params, output_range)

    # f32 path: faithful to the PyTorch float32 module (tolerance covers MXU
    # default-precision differences between the kernel and the XLA reference).
    d32, c32 = deformed_implicit_field_forward(
        coords, params, output_range, use_bf16=False)
    jax.block_until_ready((d32, c32))
    assert d32.shape == (300, 3) and c32.shape == (300, 1)
    assert jnp.allclose(d32, ref_def, atol=2e-2, rtol=2e-2)
    assert jnp.allclose(c32, ref_cor, atol=2e-2, rtol=2e-2)

    # bf16 hidden-matmul path (recommended on v5e/v6e/v7x for MXU throughput);
    # tolerance matches bf16 rounding accumulated over 3 hidden layers.
    d16, c16 = deformed_implicit_field_forward(
        coords, params, output_range, use_bf16=True)
    jax.block_until_ready((d16, c16))
    assert d16.shape == (300, 3) and c16.shape == (300, 1)
    assert jnp.allclose(d16, ref_def, atol=2e-1, rtol=2e-1)
    assert jnp.allclose(c16, ref_cor, atol=2e-1, rtol=2e-1)

    print("KERNEL_OK")
</pallas_src>

<mosaic_0001>
module attributes {stable_mosaic.version = 11 : i64} {
  func.func @_mlp_kernel(%arg0: i32, %arg1: memref<256x3xf32, #tpu.memory_space<vmem>>, %arg2: memref<3x128xf32, #tpu.memory_space<vmem>>, %arg3: memref<1x128xf32, #tpu.memory_space<vmem>>, %arg4: memref<3x128x128xf32, #tpu.memory_space<vmem>>, %arg5: memref<3x1x128xf32, #tpu.memory_space<vmem>>, %arg6: memref<4x128xf32, #tpu.memory_space<vmem>>, %arg7: memref<1x4xf32, #tpu.memory_space<vmem>>, %arg8: memref<256x4xf32, #tpu.memory_space<vmem>>) attributes {dimension_semantics = [#tpu.dimension_semantics<parallel>], iteration_bounds = array<i64: 2>, scalar_prefetch = 0 : i64, scratch_operands = 0 : i64, tpu.core_type = #tpu.core_type<tc>, window_params = [{transform_indices = @transform_0, window_bounds = array<i64: 256, 3>}, {pipeline_mode = #tpu.pipeline_mode<synchronous>, transform_indices = @transform_1, window_bounds = array<i64: 3, 128>}, {pipeline_mode = #tpu.pipeline_mode<synchronous>, transform_indices = @transform_2, window_bounds = array<i64: 1, 128>}, {pipeline_mode = #tpu.pipeline_mode<synchronous>, transform_indices = @transform_3, window_bounds = array<i64: 3, 128, 128>}, {pipeline_mode = #tpu.pipeline_mode<synchronous>, transform_indices = @transform_4, window_bounds = array<i64: 3, 1, 128>}, {pipeline_mode = #tpu.pipeline_mode<synchronous>, transform_indices = @transform_5, window_bounds = array<i64: 4, 128>}, {pipeline_mode = #tpu.pipeline_mode<synchronous>, transform_indices = @transform_6, window_bounds = array<i64: 1, 4>}, {transform_indices = @transform_7, window_bounds = array<i64: 256, 4>}]} {
    %c0 = arith.constant 0 : index
    %c0_0 = arith.constant 0 : index
    %0 = vector.load %arg1[%c0, %c0_0] : memref<256x3xf32, #tpu.memory_space<vmem>>, vector<256x3xf32>
    %1 = vector.extract_strided_slice %0 {offsets = [0, 0], sizes = [256, 1], strides = [1, 1]} : vector<256x3xf32> to vector<256x1xf32>
    %c0_1 = arith.constant 0 : index
    %c0_2 = arith.constant 0 : index
    %2 = vector.load %arg2[%c0_1, %c0_2] : memref<3x128xf32, #tpu.memory_space<vmem>>, vector<1x128xf32>
    %3 = vector.broadcast %1 : vector<256x1xf32> to vector<256x128xf32>
    %4 = vector.broadcast %2 : vector<1x128xf32> to vector<256x128xf32>
    %5 = arith.mulf %3, %4 : vector<256x128xf32>
    %6 = vector.extract_strided_slice %0 {offsets = [0, 1], sizes = [256, 1], strides = [1, 1]} : vector<256x3xf32> to vector<256x1xf32>
    %c1 = arith.constant 1 : index
    %c0_3 = arith.constant 0 : index
    %7 = vector.load %arg2[%c1, %c0_3] : memref<3x128xf32, #tpu.memory_space<vmem>>, vector<1x128xf32>
    %8 = vector.broadcast %6 : vector<256x1xf32> to vector<256x128xf32>
    %9 = vector.broadcast %7 : vector<1x128xf32> to vector<256x128xf32>
    %10 = arith.mulf %8, %9 : vector<256x128xf32>
    %11 = arith.addf %5, %10 : vector<256x128xf32>
    %12 = vector.extract_strided_slice %0 {offsets = [0, 2], sizes = [256, 1], strides = [1, 1]} : vector<256x3xf32> to vector<256x1xf32>
    %c2 = arith.constant 2 : index
    %c0_4 = arith.constant 0 : index
    %13 = vector.load %arg2[%c2, %c0_4] : memref<3x128xf32, #tpu.memory_space<vmem>>, vector<1x128xf32>
    %14 = vector.broadcast %12 : vector<256x1xf32> to vector<256x128xf32>
    %15 = vector.broadcast %13 : vector<1x128xf32> to vector<256x128xf32>
    %16 = arith.mulf %14, %15 : vector<256x128xf32>
    %17 = arith.addf %11, %16 : vector<256x128xf32>
    %c0_5 = arith.constant 0 : index
    %c0_6 = arith.constant 0 : index
    %18 = vector.load %arg3[%c0_5, %c0_6] : memref<1x128xf32, #tpu.memory_space<vmem>>, vector<1x128xf32>
    %19 = vector.broadcast %18 : vector<1x128xf32> to vector<256x128xf32>
    %20 = arith.addf %17, %19 : vector<256x128xf32>
    %cst = arith.constant 0.000000e+00 : f32
    %21 = vector.broadcast %cst : f32 to vector<256x128xf32>
    %22 = arith.maximumf %20, %21 : vector<256x128xf32>
    %c0_7 = arith.constant 0 : index
    %c0_8 = arith.constant 0 : index
    %c0_9 = arith.constant 0 : index
    %23 = vector.load %arg4[%c0_7, %c0_8, %c0_9] : memref<3x128x128xf32, #tpu.memory_space<vmem>>, vector<1x128x128xf32>
    %24 = vector.shape_cast %23 : vector<1x128x128xf32> to vector<128x128xf32>
    %cst_10 = arith.constant dense<0.000000e+00> : vector<256x128xf32>
    %25 = tpu.matmul %22, %24, %cst_10 {dimension_numbers = #tpu.dot_dimension_numbers<[1], [0], [0], [1], [0, 0, 1, 1], [], []>} : vector<256x128xf32>, vector<128x128xf32>, vector<256x128xf32> -> vector<256x128xf32>
    %c0_11 = arith.constant 0 : index
    %c0_12 = arith.constant 0 : index
    %c0_13 = arith.constant 0 : index
    %26 = vector.load %arg5[%c0_11, %c0_12, %c0_13] : memref<3x1x128xf32, #tpu.memory_space<vmem>>, vector<1x1x128xf32>
    %27 = vector.shape_cast %26 : vector<1x1x128xf32> to vector<1x128xf32>
    %28 = vector.broadcast %27 : vector<1x128xf32> to vector<256x128xf32>
    %29 = arith.addf %25, %28 : vector<256x128xf32>
    %cst_14 = arith.constant 0.000000e+00 : f32
    %30 = vector.broadcast %cst_14 : f32 to vector<256x128xf32>
    %31 = arith.maximumf %29, %30 : vector<256x128xf32>
    %c1_15 = arith.constant 1 : index
    %c0_16 = arith.constant 0 : index
    %c0_17 = arith.constant 0 : index
    %32 = vector.load %arg4[%c1_15, %c0_16, %c0_17] : memref<3x128x128xf32, #tpu.memory_space<vmem>>, vector<1x128x128xf32>
    %33 = vector.shape_cast %32 : vector<1x128x128xf32> to vector<128x128xf32>
    %cst_18 = arith.constant dense<0.000000e+00> : vector<256x128xf32>
    %34 = tpu.matmul %31, %33, %cst_18 {dimension_numbers = #tpu.dot_dimension_numbers<[1], [0], [0], [1], [0, 0, 1, 1], [], []>} : vector<256x128xf32>, vector<128x128xf32>, vector<256x128xf32> -> vector<256x128xf32>
    %c1_19 = arith.constant 1 : index
    %c0_20 = arith.constant 0 : index
    %c0_21 = arith.constant 0 : index
    %35 = vector.load %arg5[%c1_19, %c0_20, %c0_21] : memref<3x1x128xf32, #tpu.memory_space<vmem>>, vector<1x1x128xf32>
    %36 = vector.shape_cast %35 : vector<1x1x128xf32> to vector<1x128xf32>
    %37 = vector.broadcast %36 : vector<1x128xf32> to vector<256x128xf32>
    %38 = arith.addf %34, %37 : vector<256x128xf32>
    %cst_22 = arith.constant 0.000000e+00 : f32
    %39 = vector.broadcast %cst_22 : f32 to vector<256x128xf32>
    %40 = arith.maximumf %38, %39 : vector<256x128xf32>
    %c2_23 = arith.constant 2 : index
    %c0_24 = arith.constant 0 : index
    %c0_25 = arith.constant 0 : index
    %41 = vector.load %arg4[%c2_23, %c0_24, %c0_25] : memref<3x128x128xf32, #tpu.memory_space<vmem>>, vector<1x128x128xf32>
    %42 = vector.shape_cast %41 : vector<1x128x128xf32> to vector<128x128xf32>
    %cst_26 = arith.constant dense<0.000000e+00> : vector<256x128xf32>
    %43 = tpu.matmul %40, %42, %cst_26 {dimension_numbers = #tpu.dot_dimension_numbers<[1], [0], [0], [1], [0, 0, 1, 1], [], []>} : vector<256x128xf32>, vector<128x128xf32>, vector<256x128xf32> -> vector<256x128xf32>
    %c2_27 = arith.constant 2 : index
    %c0_28 = arith.constant 0 : index
    %c0_29 = arith.constant 0 : index
    %44 = vector.load %arg5[%c2_27, %c0_28, %c0_29] : memref<3x1x128xf32, #tpu.memory_space<vmem>>, vector<1x1x128xf32>
    %45 = vector.shape_cast %44 : vector<1x1x128xf32> to vector<1x128xf32>
    %46 = vector.broadcast %45 : vector<1x128xf32> to vector<256x128xf32>
    %47 = arith.addf %43, %46 : vector<256x128xf32>
    %cst_30 = arith.constant 0.000000e+00 : f32
    %48 = vector.broadcast %cst_30 : f32 to vector<256x128xf32>
    %49 = arith.maximumf %47, %48 : vector<256x128xf32>
    %c0_31 = arith.constant 0 : index
    %c0_32 = arith.constant 0 : index
    %50 = vector.load %arg6[%c0_31, %c0_32] : memref<4x128xf32, #tpu.memory_space<vmem>>, vector<1x128xf32>
    %51 = vector.broadcast %50 : vector<1x128xf32> to vector<256x128xf32>
    %52 = arith.mulf %49, %51 : vector<256x128xf32>
    %cst_33 = arith.constant dense<0.000000e+00> : vector<256xf32>
    %53 = vector.multi_reduction <add>, %52, %cst_33 [1] : vector<256x128xf32> to vector<256xf32>
    %54 = vector.shape_cast %53 : vector<256xf32> to vector<256x1xf32>
    %c0_34 = arith.constant 0 : index
    %c0_35 = arith.constant 0 : index
    %55 = vector.load %arg7[%c0_34, %c0_35] : memref<1x4xf32, #tpu.memory_space<vmem>>, vector<1x1xf32>
    %56 = vector.broadcast %55 : vector<1x1xf32> to vector<256x1xf32>
    %57 = arith.addf %54, %56 : vector<256x1xf32>
    %c0_36 = arith.constant 0 : index
    %c0_37 = arith.constant 0 : index
    %58 = vector.load %arg8[%c0_36, %c0_37] : memref<256x4xf32, #tpu.memory_space<vmem>>, vector<256x1xf32>
    tpu.vector_store %arg8[%c0_36, %c0_37], %57 {strides = array<i32>} : memref<256x4xf32, #tpu.memory_space<vmem>>, vector<256x1xf32>,
    %c1_38 = arith.constant 1 : index
    %c0_39 = arith.constant 0 : index
    %59 = vector.load %arg6[%c1_38, %c0_39] : memref<4x128xf32, #tpu.memory_space<vmem>>, vector<1x128xf32>
    %60 = vector.broadcast %59 : vector<1x128xf32> to vector<256x128xf32>
    %61 = arith.mulf %49, %60 : vector<256x128xf32>
    %cst_40 = arith.constant dense<0.000000e+00> : vector<256xf32>
    %62 = vector.multi_reduction <add>, %61, %cst_40 [1] : vector<256x128xf32> to vector<256xf32>
    %63 = vector.shape_cast %62 : vector<256xf32> to vector<256x1xf32>
    %c0_41 = arith.constant 0 : index
    %c1_42 = arith.constant 1 : index
    %64 = vector.load %arg7[%c0_41, %c1_42] : memref<1x4xf32, #tpu.memory_space<vmem>>, vector<1x1xf32>
    %65 = vector.broadcast %64 : vector<1x1xf32> to vector<256x1xf32>
    %66 = arith.addf %63, %65 : vector<256x1xf32>
    %c0_43 = arith.constant 0 : index
    %c1_44 = arith.constant 1 : index
    %67 = vector.load %arg8[%c0_43, %c1_44] : memref<256x4xf32, #tpu.memory_space<vmem>>, vector<256x1xf32>
    tpu.vector_store %arg8[%c0_43, %c1_44], %66 {strides = array<i32>} : memref<256x4xf32, #tpu.memory_space<vmem>>, vector<256x1xf32>,
    %c2_45 = arith.constant 2 : index
    %c0_46 = arith.constant 0 : index
    %68 = vector.load %arg6[%c2_45, %c0_46] : memref<4x128xf32, #tpu.memory_space<vmem>>, vector<1x128xf32>
    %69 = vector.broadcast %68 : vector<1x128xf32> to vector<256x128xf32>
    %70 = arith.mulf %49, %69 : vector<256x128xf32>
    %cst_47 = arith.constant dense<0.000000e+00> : vector<256xf32>
    %71 = vector.multi_reduction <add>, %70, %cst_47 [1] : vector<256x128xf32> to vector<256xf32>
    %72 = vector.shape_cast %71 : vector<256xf32> to vector<256x1xf32>
    %c0_48 = arith.constant 0 : index
    %c2_49 = arith.constant 2 : index
    %73 = vector.load %arg7[%c0_48, %c2_49] : memref<1x4xf32, #tpu.memory_space<vmem>>, vector<1x1xf32>
    %74 = vector.broadcast %73 : vector<1x1xf32> to vector<256x1xf32>
    %75 = arith.addf %72, %74 : vector<256x1xf32>
    %c0_50 = arith.constant 0 : index
    %c2_51 = arith.constant 2 : index
    %76 = vector.load %arg8[%c0_50, %c2_51] : memref<256x4xf32, #tpu.memory_space<vmem>>, vector<256x1xf32>
    tpu.vector_store %arg8[%c0_50, %c2_51], %75 {strides = array<i32>} : memref<256x4xf32, #tpu.memory_space<vmem>>, vector<256x1xf32>,
    %c3 = arith.constant 3 : index
    %c0_52 = arith.constant 0 : index
    %77 = vector.load %arg6[%c3, %c0_52] : memref<4x128xf32, #tpu.memory_space<vmem>>, vector<1x128xf32>
    %78 = vector.broadcast %77 : vector<1x128xf32> to vector<256x128xf32>
    %79 = arith.mulf %49, %78 : vector<256x128xf32>
    %cst_53 = arith.constant dense<0.000000e+00> : vector<256xf32>
    %80 = vector.multi_reduction <add>, %79, %cst_53 [1] : vector<256x128xf32> to vector<256xf32>
    %81 = vector.shape_cast %80 : vector<256xf32> to vector<256x1xf32>
    %c0_54 = arith.constant 0 : index
    %c3_55 = arith.constant 3 : index
    %82 = vector.load %arg7[%c0_54, %c3_55] : memref<1x4xf32, #tpu.memory_space<vmem>>, vector<1x1xf32>
    %83 = vector.broadcast %82 : vector<1x1xf32> to vector<256x1xf32>
    %84 = arith.addf %81, %83 : vector<256x1xf32>
    %c0_56 = arith.constant 0 : index
    %c3_57 = arith.constant 3 : index
    %85 = vector.load %arg8[%c0_56, %c3_57] : memref<256x4xf32, #tpu.memory_space<vmem>>, vector<256x1xf32>
    tpu.vector_store %arg8[%c0_56, %c3_57], %84 {strides = array<i32>} : memref<256x4xf32, #tpu.memory_space<vmem>>, vector<256x1xf32>,
    return
  }
  func.func @transform_0(%arg0: i32) -> (i32, i32) {
    %c0_i32 = arith.constant 0 : i32
    %c0_i32_0 = arith.constant 0 : i32
    return %arg0, %c0_i32 : i32, i32
  }
  func.func @transform_1(%arg0: i32) -> (i32, i32) {
    %c0_i32 = arith.constant 0 : i32
    %c0_i32_0 = arith.constant 0 : i32
    %c0_i32_1 = arith.constant 0 : i32
    return %c0_i32, %c0_i32_0 : i32, i32
  }
  func.func @transform_2(%arg0: i32) -> (i32, i32) {
    %c0_i32 = arith.constant 0 : i32
    %c0_i32_0 = arith.constant 0 : i32
    %c0_i32_1 = arith.constant 0 : i32
    return %c0_i32, %c0_i32_0 : i32, i32
  }
  func.func @transform_3(%arg0: i32) -> (i32, i32, i32) {
    %c0_i32 = arith.constant 0 : i32
    %c0_i32_0 = arith.constant 0 : i32
    %c0_i32_1 = arith.constant 0 : i32
    %c0_i32_2 = arith.constant 0 : i32
    return %c0_i32, %c0_i32_0, %c0_i32_1 : i32, i32, i32
  }
  func.func @transform_4(%arg0: i32) -> (i32, i32, i32) {
    %c0_i32 = arith.constant 0 : i32
    %c0_i32_0 = arith.constant 0 : i32
    %c0_i32_1 = arith.constant 0 : i32
    %c0_i32_2 = arith.constant 0 : i32
    return %c0_i32, %c0_i32_0, %c0_i32_1 : i32, i32, i32
  }
  func.func @transform_5(%arg0: i32) -> (i32, i32) {
    %c0_i32 = arith.constant 0 : i32
    %c0_i32_0 = arith.constant 0 : i32
    %c0_i32_1 = arith.constant 0 : i32
    return %c0_i32, %c0_i32_0 : i32, i32
  }
  func.func @transform_6(%arg0: i32) -> (i32, i32) {
    %c0_i32 = arith.constant 0 : i32
    %c0_i32_0 = arith.constant 0 : i32
    %c0_i32_1 = arith.constant 0 : i32
    return %c0_i32, %c0_i32_0 : i32, i32
  }
  func.func @transform_7(%arg0: i32) -> (i32, i32) {
    %c0_i32 = arith.constant 0 : i32
    %c0_i32_0 = arith.constant 0 : i32
    return %arg0, %c0_i32 : i32, i32
  }
}

</mosaic_0001>

<bundles_post_ra>
// kernel: deformed_implicit_field_forward.1
= control target key start
LH: loop header
LB: loop body
LE: loop exit
PB: predicated region body
PF: predicated region fallthrough
CT: control target
= control target key end

     0   :  { %s3160_s24 = smov 0   ;;  %s4336_s0 = inlined_call_operand.vmem [shape: f32[512,3], index: 0, kind: input, shape index: {}]   ;;  %s4337_s1 = inlined_call_operand.vmem [shape: f32[3,128], index: 1, kind: input, shape index: {}]   ;;  %s4338_s2 = inlined_call_operand.vmem [shape: f32[1,128], index: 2, kind: input, shape index: {}]   ;;  %s4339_s3 = inlined_call_operand.vmem [shape: f32[3,128,128], index: 3, kind: input, shape index: {}]   ;;  %s4340_s4 = inlined_call_operand.vmem [shape: f32[3,1,128], index: 4, kind: input, shape index: {}]   ;;  %s4341_s5 = inlined_call_operand.vmem [shape: f32[4,128], index: 5, kind: input, shape index: {}]   ;;  %s4342_s6 = inlined_call_operand.vmem [shape: f32[1,4], index: 6, kind: input, shape index: {}]   ;;  %s4343_s7 = inlined_call_operand.vmem [shape: f32[512,4], index: 7, kind: output, shape index: {}]  }
   0x1 LB: > { %s2568_s25 = sadd.s32 4294967295, %s3115_s24   ;;  %p2572_p0 = scmp.ge.s32.totalorder %s3115_s24, 1  ;;  %s3115_s24 = sphi %s3160_s24, %s17_s24  }
   0x2   : > { %p238_p1 = scmp.lt.s32.totalorder %s3115_s24, 3 }
   0x4   : > { %p239_p2 = pnand %p2572_p0, %p238_p1 }
   0x5   : > { %s2573_s26 = sshll.u32 (!%p239_p2), %s2568_s25, 5 }
   0x6   : > { %242 = sbr.rel (%p239_p2) target bundleno = 1241 (0x4d9), region = 48  ;;  %p271_p3 = scmp.lt.s32.totalorder (!%p239_p2), %s2573_s26, 63 }
   0xb   : > { %v3117_v0 = vmov 0   ;;  %s4345_s26 = smov (!%p271_p3, %s2573_s26), 63  ;;  %v3118_v3 = vmov 1   ;;  %v3119_v5 = vmov 2   ;;  %v991_v16 = vld [vmem:[%s4339_s3 + $0x78] sm:$0xff]  ;;  %v990_v18 = vld [vmem:[%s4339_s3 + $0x70] sm:$0xff] }
   0xc   : > { %3057 = vset.pattern.permute.xlu1 %v3117_v0  ;;  %3055 = vset.pattern.permute.xlu0 %v3117_v0  ;;  %s2574_s27 = sshll.u32 %s4345_s26, 3  ;;  %v989_v19 = vld [vmem:[%s4339_s3 + $0x68] sm:$0xff]  ;;  %v988_v21 = vld [vmem:[%s4339_s3 + $0x60] sm:$0xff]  ;;  %v987_v23 = vld [vmem:[%s4339_s3 + $0x58] sm:$0xff]  ;;  %vm1960_vm0 = vcmask 7168   ;;  %vm2133_vm1 = vcmask 15368  }
   0xd   : > { %s3178_s30 = scalar_lea.vmem %s4336_s0, %s2574_s27  ;;  %2772 = vmatprep.subr.mxu0 %v991_v16  ;;  %3012 = vmatprep.subr.mxu1 %v991_v16  ;;  %v986_v25 = vld [vmem:[%s4339_s3 + $0x50] sm:$0xff]  ;;  %v985_v26 = vld [vmem:[%s4339_s3 + $0x48] sm:$0xff]  ;;  %v984_v28 = vld [vmem:[%s4339_s3 + $0x40] sm:$0xff]  ;;  %vm2306_vm2 = vcmask 23568   ;;  %vm2479_vm3 = vcmask 31768  }
   0xe   : > { %v3181_v1 = vld [vmem:[%s3178_s30 + $0x8] sm:$0xff]  ;;  %v282_v2 = vld [vmem:[%s3178_s30] sm:$0xff]  ;;  %v3189_v4 = vld [vmem:[%s3178_s30 + $0x18] sm:$0xff]  ;;  %2773 = vmatpush3.msra.mxu0 %v991_v16  ;;  %3028 = vmatpush3.msra.mxu1 %v991_v16 }
   0xf   : > { %322 = vperm.xlu1 %3057, %v3181_v1   ;;  %317 = vperm.xlu0 %3055, %v282_v2   ;;  %v3195_v6 = vld [vmem:[%s3178_s30 + $0x28] sm:$0xff]  ;;  %v284_v7 = vld [vmem:[%s3178_s30 + $0x10] sm:$0xff]  ;;  %v3201_v8 = vld [vmem:[%s3178_s30 + $0x38] sm:$0xff] }
  0x10   : > { %v3206_v9 = vld [vmem:[%s3178_s30 + $0x48] sm:$0xff]  ;;  %v3210_v10 = vld [vmem:[%s3178_s30 + $0x58] sm:$0xff]  ;;  %v286_v12 = vld [vmem:[%s3178_s30 + $0x20] sm:$0xff]  ;;  %2774 = vmatprep.subr.mxu0 %v990_v18  ;;  %3013 = vmatprep.subr.mxu1 %v990_v18 }
  0x11   : > { %v3215_v11 = vld [vmem:[%s3178_s30 + $0x68] sm:$0xff]  ;;  %v3221_v13 = vld [vmem:[%s3178_s30 + $0x78] sm:$0xff]  ;;  %2775 = vmatpush3.msra.mxu0 %v990_v18  ;;  %v288_v22 = vld [vmem:[%s3178_s30 + $0x30] sm:$0xff]  ;;  %3029 = vmatpush3.msra.mxu1 %v990_v18 }
  0x12   : > { %v3226_v14 = vld [vmem:[%s3178_s30 + $0x88] sm:$0xff]  ;;  %v3231_v15 = vld [vmem:[%s3178_s30 + $0x98] sm:$0xff]  ;;  %2776 = vmatprep.subr.mxu0 %v989_v19  ;;  %3014 = vmatprep.subr.mxu1 %v989_v19  ;;  %v982_v31 = vld [vmem:[%s4339_s3 + $0x30] sm:$0xff] }
  0x13   : > { %3058 = vset.pattern.permute.xlu1 %v3118_v3  ;;  %3056 = vset.pattern.permute.xlu0 %v3118_v3  ;;  %v3239_v17 = vld [vmem:[%s3178_s30 + $0xa8] sm:$0xff]  ;;  %v3250_v20 = vld [vmem:[%s3178_s30 + $0xb8] sm:$0xff]  ;;  %v980_v34 = vld [vmem:[%s4339_s3 + $0x20] sm:$0xff] }
  0x14   : > { %517 = vperm.xlu1 %3058, %v3181_v1   ;;  %513 = vperm.xlu0 %3056, %v282_v2   ;;  %v3261_v24 = vld [vmem:[%s3178_s30 + $0xc8] sm:$0xff]  ;;  %v3272_v27 = vld [vmem:[%s3178_s30 + $0xd8] sm:$0xff]  ;;  %v290_v36 = vld [vmem:[%s3178_s30 + $0x40] sm:$0xff] }
  0x15   : > { %2777 = vmatpush3.msra.mxu0 %v989_v19  ;;  %3030 = vmatpush3.msra.mxu1 %v989_v19  ;;  %v983_v29 = vld [vmem:[%s4339_s3 + $0x38] sm:$0xff]  ;;  %v3283_v30 = vld [vmem:[%s3178_s30 + $0xe8] sm:$0xff]  ;;  %v978_v37 = vld [vmem:[%s4339_s3 + $0x10] sm:$0xff] }
  0x16   : > { %2778 = vmatprep.subr.mxu0 %v988_v21  ;;  %3015 = vmatprep.subr.mxu1 %v988_v21  ;;  %v981_v32 = vld [vmem:[%s4339_s3 + $0x28] sm:$0xff]  ;;  %v3294_v33 = vld [vmem:[%s3178_s30 + $0xf8] sm:$0xff]  ;;  %v976_v39 = vld [vmem:[%s4339_s3] sm:$0xff] }
  0x17   : > { %2779 = vmatpush3.msra.mxu0 %v988_v21  ;;  %3031 = vmatpush3.msra.mxu1 %v988_v21  ;;  %v979_v35 = vld [vmem:[%s4339_s3 + $0x18] sm:$0xff]  ;;  %v977_v38 = vld [vmem:[%s4339_s3 + $0x8] sm:$0xff]  ;;  %v292_v40 = vld [vmem:[%s3178_s30 + $0x50] sm:$0xff] }
  0x18   : > { %3059 = vset.pattern.permute.xlu1 %v3119_v5  ;;  %3062 = vset.pattern.permute.xlu0 %v3117_v0  ;;  %v294_v41 = vld [vmem:[%s3178_s30 + $0x60] sm:$0xff]  ;;  %v296_v44 = vld [vmem:[%s3178_s30 + $0x70] sm:$0xff] }
  0x19   : > { %710 = vperm.xlu1 %3059, %v282_v2   ;;  %332 = vperm.xlu0 %3062, %v3189_v4   ;;  %v3349_v45 = vld [vmem:[%s4337_s1] ss:$0 sm:$0xff]  ;;  %v3356_v47 = vld [vmem:[%s4337_s1 + $0x1] ss:$0 sm:$0xff]  ;;  %v3366_v51 = vld [vmem:[%s4337_s1 + $0x2] ss:$0 sm:$0xff] }
  0x1a   : > { %2780 = vmatprep.subr.mxu0 %v987_v23  ;;  %3016 = vmatprep.subr.mxu1 %v987_v23  ;;  %v3375_v56 = vld [vmem:[%s4338_s2] ss:$0 sm:$0xff] }
  0x1b   : > { %2781 = vmatpush3.msra.mxu0 %v987_v23  ;;  %3032 = vmatpush3.msra.mxu1 %v987_v23  ;;  %v298_v2 = vld [vmem:[%s3178_s30 + $0x80] sm:$0xff] }
  0x1c   : > { %2782 = vmatprep.subr.mxu0 %v986_v25  ;;  %3017 = vmatprep.subr.mxu1 %v986_v25 }
  0x1d   : > { %3060 = vset.pattern.permute.xlu1 %v3117_v0  ;;  %342 = vperm.xlu0 %3062, %v3195_v6  }
  0x1e   : > { %327 = vperm.xlu1 %3060, %v284_v7   ;;  %2783 = vmatpush3.msra.mxu0 %v986_v25 }
  0x1f   : > { %2784 = vmatprep.subr.mxu0 %v985_v26  ;;  %3033 = vmatpush3.msra.mxu1 %v986_v25 }
  0x20   : > { %2785 = vmatpush3.msra.mxu0 %v985_v26  ;;  %3018 = vmatprep.subr.mxu1 %v985_v26 }
  0x21   : > { %352 = vperm.xlu0 %3062, %v3201_v8   ;;  %2786 = vmatprep.subr.mxu0 %v984_v28 }
  0x22   : > { %3061 = vset.pattern.permute.xlu1 %v3118_v3  ;;  %2787 = vmatpush3.msra.mxu0 %v984_v28 }
  0x23   : > { %521 = vperm.xlu1 %3061, %v284_v7   ;;  %2788 = vmatprep.subr.mxu0 %v983_v29 }
  0x24   : > { %2789 = vmatpush3.msra.mxu0 %v983_v29  ;;  %3034 = vmatpush3.msra.mxu1 %v985_v26 }
  0x25   : > { %362 = vperm.xlu0 %3062, %v3206_v9   ;;  %2790 = vmatprep.subr.mxu0 %v982_v31 }
  0x26   : > { %2791 = vmatpush3.msra.mxu0 %v982_v31  ;;  %3019 = vmatprep.subr.mxu1 %v984_v28 }
  0x27   : > { %525 = vperm.xlu1 %3061, %v3189_v4   ;;  %2792 = vmatprep.subr.mxu0 %v981_v32 }
  0x28   : > { %2793 = vmatpush3.msra.mxu0 %v981_v32  ;;  %3035 = vmatpush3.msra.mxu1 %v984_v28  ;;  %v302_v28 = vld [vmem:[%s3178_s30 + $0xa0] sm:$0xff] }
  0x29   : > { %372 = vperm.xlu0 %3062, %v3210_v10   ;;  %2794 = vmatprep.subr.mxu0 %v980_v34 }
  0x2a   : > { %2795 = vmatpush3.msra.mxu0 %v980_v34  ;;  %3020 = vmatprep.subr.mxu1 %v983_v29 }
  0x2b   : > { %3063 = vset.pattern.permute.xlu1 %v3119_v5  ;;  %2796 = vmatprep.subr.mxu0 %v979_v35 }
  0x2c   : > { %718 = vperm.xlu1 %3063, %v284_v7   ;;  %2797 = vmatpush3.msra.mxu0 %v979_v35 }
  0x2d   : > { %382 = vperm.xlu0 %3062, %v3215_v11   ;;  %2798 = vmatprep.subr.mxu0 %v978_v37 }
  0x2e   : > { %2799 = vmatpush3.msra.mxu0 %v978_v37  ;;  %3036 = vmatpush3.msra.mxu1 %v983_v29 }
  0x2f   : > { %2800 = vmatprep.subr.mxu0 %v977_v38  ;;  %3021 = vmatprep.subr.mxu1 %v982_v31 }
  0x30   : > { %3064 = vset.pattern.permute.xlu1 %v3117_v0  ;;  %2801 = vmatpush3.msra.mxu0 %v977_v38 }
  0x31   : > { %337 = vperm.xlu1 %3064, %v286_v12   ;;  %392 = vperm.xlu0 %3062, %v3221_v13  }
  0x32   : > { %2802 = vmatprep.subr.mxu0 %v976_v39  ;;  %3037 = vmatpush3.msra.mxu1 %v982_v31 }
  0x33   : > { %2803 = vmatpush3.msra.mxu0 %v976_v39  ;;  %3022 = vmatprep.subr.mxu1 %v981_v32 }
  0x34   : > { %3038 = vmatpush3.msra.mxu1 %v981_v32 }
  0x35   : > { %3065 = vset.pattern.permute.xlu1 %v3118_v3  ;;  %402 = vperm.xlu0 %3062, %v3226_v14  }
  0x36   : > { %529 = vperm.xlu1 %3065, %v286_v12   ;;  %3023 = vmatprep.subr.mxu1 %v980_v34 }
  0x37   : > { %3039 = vmatpush3.msra.mxu1 %v980_v34 }
  0x38   : > { %3024 = vmatprep.subr.mxu1 %v979_v35 }
  0x39   : > { %412 = vperm.xlu0 %3062, %v3231_v15   ;;  %3040 = vmatpush3.msra.mxu1 %v979_v35 }
  0x3a   : > { %533 = vperm.xlu1 %3065, %v3195_v6   ;;  %3025 = vmatprep.subr.mxu1 %v978_v37 }
  0x3b   : > { %3041 = vmatpush3.msra.mxu1 %v978_v37 }
  0x3c   : > { %3026 = vmatprep.subr.mxu1 %v977_v38 }
  0x3d   : > { %422 = vperm.xlu0 %3062, %v3239_v17   ;;  %3042 = vmatpush3.msra.mxu1 %v977_v38 }
  0x3e   : > { %3066 = vset.pattern.permute.xlu1 %v3119_v5  ;;  %3027 = vmatprep.subr.mxu1 %v976_v39 }
  0x3f   : > { %726 = vperm.xlu1 %3066, %v286_v12   ;;  %3043 = vmatpush3.msra.mxu1 %v976_v39 }
  0x41   : > { %432 = vperm.xlu0 %3062, %v3250_v20  }
  0x43   : > { %3067 = vset.pattern.permute.xlu1 %v3117_v0 }
  0x44   : > { %347 = vperm.xlu1 %3067, %v288_v22  }
  0x45   : > { %442 = vperm.xlu0 %3062, %v3261_v24  }
  0x48   : > { %3068 = vset.pattern.permute.xlu1 %v3118_v3 }
  0x49   : > { %537 = vperm.xlu1 %3068, %v288_v22   ;;  %452 = vperm.xlu0 %3062, %v3272_v27  }
  0x4d   : > { %541 = vperm.xlu1 %3068, %v3201_v8   ;;  %462 = vperm.xlu0 %3062, %v3283_v30  }
  0x51   : > { %3069 = vset.pattern.permute.xlu1 %v3119_v5  ;;  %472 = vperm.xlu0 %3062, %v3294_v33  }
  0x52   : > { %734 = vperm.xlu1 %3069, %v288_v22  }
  0x55   : > { %3105 = vset.pattern.permute.xlu0 %v3119_v5 }
  0x56   : > { %3070 = vset.pattern.permute.xlu1 %v3117_v0  ;;  %714 = vperm.xlu0 %3105, %v3181_v1  }
  0x57   : > { %357 = vperm.xlu1 %3070, %v290_v36  }
  0x5a   : > { %722 = vperm.xlu0 %3105, %v3189_v4  }
  0x5b   : > { %3071 = vset.pattern.permute.xlu1 %v3118_v3 }
  0x5c   : > { %545 = vperm.xlu1 %3071, %v290_v36  }
  0x5e   : > { %730 = vperm.xlu0 %3105, %v3195_v6  }
  0x60   : > { %549 = vperm.xlu1 %3071, %v3206_v9  }
  0x62   : > { %738 = vperm.xlu0 %3105, %v3201_v8  }
  0x64   : > { %3072 = vset.pattern.permute.xlu1 %v3119_v5 }
  0x65   : > { %742 = vperm.xlu1 %3072, %v290_v36  }
  0x66   : > { %746 = vperm.xlu0 %3105, %v3206_v9  }
  0x69   : > { %3073 = vset.pattern.permute.xlu1 %v3117_v0 }
  0x6a   : > { %367 = vperm.xlu1 %3073, %v292_v40   ;;  %754 = vperm.xlu0 %3105, %v3210_v10  }
  0x6e   : > { %3074 = vset.pattern.permute.xlu1 %v3118_v3  ;;  %762 = vperm.xlu0 %3105, %v3215_v11  }
  0x6f   : > { %553 = vperm.xlu1 %3074, %v292_v40  }
  0x72   : > { %770 = vperm.xlu0 %3105, %v3221_v13  }
  0x73   : > { %557 = vperm.xlu1 %3074, %v3210_v10  }
  0x76   : > { %778 = vperm.xlu0 %3105, %v3226_v14  }
  0x77   : > { %3075 = vset.pattern.permute.xlu1 %v3119_v5 }
  0x78   : > { %750 = vperm.xlu1 %3075, %v292_v40  }
  0x7a   : > { %786 = vperm.xlu0 %3105, %v3231_v15  }
  0x7c   : > { %3076 = vset.pattern.permute.xlu1 %v3117_v0 }
  0x7d   : > { %377 = vperm.xlu1 %3076, %v294_v41  }
  0x7e   : > { %794 = vperm.xlu0 %3105, %v3239_v17  }
  0x81   : > { %3077 = vset.pattern.permute.xlu1 %v3118_v3 }
  0x82   : > { %561 = vperm.xlu1 %3077, %v294_v41   ;;  %802 = vperm.xlu0 %3105, %v3250_v20  }
  0x86   : > { %565 = vperm.xlu1 %3077, %v3215_v11   ;;  %810 = vperm.xlu0 %3105, %v3261_v24  }
  0x8a   : > { %v3341_v42 = vpop.permute.xlu1 %322  ;;  %3078 = vset.pattern.permute.xlu1 %v3119_v5  ;;  %818 = vperm.xlu0 %3105, %v3272_v27   ;;  %v318_v43 = vpop.permute.xlu0 %317 }
  0x8b   : > { %758 = vperm.xlu1 %3078, %v294_v41   ;;  %v479_v46 = vmul.f32 %v3349_v45, %v318_v43  ;;  %v480_v40 = vmul.f32 %v3349_v45, %v3341_v42 }
  0x8e   : > { %826 = vperm.xlu0 %3105, %v3283_v30  }
  0x8f   : > { %v3358_v48 = vpop.permute.xlu1 %517  ;;  %3079 = vset.pattern.permute.xlu1 %v3117_v0  ;;  %v514_v49 = vpop.permute.xlu0 %513 }
  0x90   : > { %387 = vperm.xlu1 %3079, %v296_v44   ;;  %v644_v50 = vmul.f32 %v3356_v47, %v514_v49  ;;  %v645_v37 = vmul.f32 %v3356_v47, %v3358_v48 }
  0x92   : > { %834 = vperm.xlu0 %3105, %v3294_v33   ;;  %v676_v52 = vadd.f32 %v644_v50, %v479_v46  ;;  %v677_v49 = vadd.f32 %v645_v37, %v480_v40 }
  0x94   : > { %3080 = vset.pattern.permute.xlu1 %v3118_v3  ;;  %v711_v53 = vpop.permute.xlu1 %710  ;;  %v3369_v54 = vpop.permute.xlu0 %332 }
  0x95   : > { %v841_v55 = vmul.f32 %v3366_v51, %v711_v53  ;;  %569 = vperm.xlu1 %3080, %v296_v44   ;;  %v482_v50 = vmul.f32 %v3349_v45, %v3369_v54 }
  0x97   : > { %v873_v57 = vadd.f32 %v841_v55, %v676_v52 }
  0x98   : > { %v3377_v58 = vpop.permute.xlu0 %342 }
  0x99   : > { %573 = vperm.xlu1 %3080, %v3221_v13   ;;  %v328_v59 = vpop.permute.xlu1 %327  ;;  %v912_v60 = vadd.f32 %v3375_v56, %v873_v57  ;;  %v300_v13 = vld [vmem:[%s3178_s30 + $0x90] sm:$0xff] }
  0x9b   : > { %v944_v61 = vmax.f32 %v912_v60, 0.0 }
  0x9c   : > { %v3381_v62 = vpop.permute.xlu0 %352 }
  0x9d   : > { %3081 = vset.pattern.permute.xlu1 %v3119_v5  ;;  %2804 = vmatprep.mubr.f32.mxu0 %v944_v61 }
  0x9e   : > { %766 = vperm.xlu1 %3081, %v296_v44   ;;  %v522_v63 = vpop.permute.xlu1 %521 }
  0x9f   : > { %v646_v32 = vmul.f32 %v3356_v47, %v522_v63 }
  0xa0   : > { %v3384_v1 = vpop.permute.xlu0 %362 }
  0xa2   : > { %3082 = vset.pattern.permute.xlu1 %v3117_v0  ;;  %v526_v4 = vpop.permute.xlu1 %525 }
  0xa3   : > { %397 = vperm.xlu1 %3082, %v298_v2   ;;  %v647_v52 = vmul.f32 %v3356_v47, %v526_v4 }
  0xa4   : > { %v3388_v6 = vpop.permute.xlu0 %372 }
  0xa7   : > { %3083 = vset.pattern.permute.xlu1 %v3118_v3  ;;  %v719_v7 = vpop.permute.xlu1 %718 }
  0xa8   : > { %577 = vperm.xlu1 %3083, %v298_v2   ;;  %v3391_v8 = vpop.permute.xlu0 %382  ;;  %v843_v35 = vmul.f32 %v3366_v51, %v719_v7 }
  0xac   : > { %581 = vperm.xlu1 %3083, %v3226_v14   ;;  %v338_v9 = vpop.permute.xlu1 %337  ;;  %v3394_v10 = vpop.permute.xlu0 %392 }
  0xad   : > { %v483_v43 = vmul.f32 %v3349_v45, %v338_v9 }
  0xb0   : > { %3084 = vset.pattern.permute.xlu1 %v3119_v5  ;;  %v3397_v11 = vpop.permute.xlu0 %402 }
  0xb1   : > { %774 = vperm.xlu1 %3084, %v298_v2   ;;  %v530_v12 = vpop.permute.xlu1 %529  ;;  %v679_v2 = vadd.f32 %v647_v52, %v482_v50 }
  0xb2   : > { %v648_v39 = vmul.f32 %v3356_v47, %v530_v12 }
  0xb4   : > { %v3400_v16 = vpop.permute.xlu0 %412  ;;  %v680_v55 = vadd.f32 %v648_v39, %v483_v43 }
  0xb5   : > { %3085 = vset.pattern.permute.xlu1 %v3117_v0  ;;  %v534_v18 = vpop.permute.xlu1 %533 }
  0xb6   : > { %407 = vperm.xlu1 %3085, %v300_v13   ;;  %v649_v4 = vmul.f32 %v3356_v47, %v534_v18 }
  0xb8   : > { %v3403_v19 = vpop.permute.xlu0 %422 }
  0xba   : > { %3086 = vset.pattern.permute.xlu1 %v3118_v3  ;;  %v727_v14 = vpop.permute.xlu1 %726 }
  0xbb   : > { %585 = vperm.xlu1 %3086, %v300_v13   ;;  %v845_v44 = vmul.f32 %v3366_v51, %v727_v14 }
  0xbc   : > { %v3406_v21 = vpop.permute.xlu0 %432 }
  0xbf   : > { %589 = vperm.xlu1 %3086, %v3231_v15   ;;  %v348_v22 = vpop.permute.xlu1 %347  ;;  %v481_v15 = vmul.f32 %v3349_v45, %v328_v59  ;;  %v877_v59 = vadd.f32 %v845_v44, %v680_v55 }
  0xc0   : > { %v3409_v23 = vpop.permute.xlu0 %442  ;;  %v485_v60 = vmul.f32 %v3349_v45, %v348_v22 }
  0xc1   : > { %v678_v38 = vadd.f32 %v646_v32, %v481_v15  ;;  %v916_v18 = vadd.f32 %v3375_v56, %v877_v59 }
  0xc3   : > { %3087 = vset.pattern.permute.xlu1 %v3119_v5  ;;  %v875_v41 = vadd.f32 %v843_v35, %v678_v38  ;;  %v304_v35 = vld [vmem:[%s3178_s30 + $0xb0] sm:$0xff] }
  0xc4   : > { %782 = vperm.xlu1 %3087, %v300_v13   ;;  %v538_v25 = vpop.permute.xlu1 %537  ;;  %v3412_v26 = vpop.permute.xlu0 %452  ;;  %v484_v13 = vmul.f32 %v3349_v45, %v3377_v58  ;;  %v486_v58 = vmul.f32 %v3349_v45, %v3381_v62  ;;  %v488_v62 = vmul.f32 %v3349_v45, %v3384_v1 }
  0xc5   : > { %v650_v42 = vmul.f32 %v3356_v47, %v538_v25  ;;  %v914_v54 = vadd.f32 %v3375_v56, %v875_v41 }
  0xc7   : > { %v682_v9 = vadd.f32 %v650_v42, %v485_v60  ;;  %v946_v15 = vmax.f32 %v914_v54, 0.0 }
  0xc8   : > { %3088 = vset.pattern.permute.xlu1 %v3117_v0  ;;  %v542_v29 = vpop.permute.xlu1 %541  ;;  %v3416_v31 = vpop.permute.xlu0 %462 }
  0xc9   : > { %417 = vperm.xlu1 %3088, %v302_v28   ;;  %v651_v37 = vmul.f32 %v3356_v47, %v542_v29 }
  0xcc   : > { %v3419_v34 = vpop.permute.xlu0 %472 }
  0xcd   : > { %3089 = vset.pattern.permute.xlu1 %v3118_v3  ;;  %v735_v36 = vpop.permute.xlu1 %734 }
  0xce   : > { %593 = vperm.xlu1 %3089, %v302_v28   ;;  %v847_v61 = vmul.f32 %v3366_v51, %v735_v36  ;;  %v681_v36 = vadd.f32 %v649_v4, %v484_v13 }
  0xd0   : > { %v879_v25 = vadd.f32 %v847_v61, %v682_v9 }
  0xd1   : > { %v715_v46 = vpop.permute.xlu0 %714 }
  0xd2   : > { %v842_v48 = vmul.f32 %v3366_v51, %v715_v46  ;;  %597 = vperm.xlu1 %3089, %v3239_v17   ;;  %v358_v53 = vpop.permute.xlu1 %357  ;;  %v948_v46 = vmax.f32 %v916_v18, 0.0  ;;  %v918_v29 = vadd.f32 %v3375_v56, %v879_v25 }
  0xd3   : > { %v487_v55 = vmul.f32 %v3349_v45, %v358_v53 }
  0xd4   : > { %v874_v57 = vadd.f32 %v842_v48, %v677_v49  ;;  %v683_v49 = vadd.f32 %v651_v37, %v486_v58  ;;  %v950_v54 = vmax.f32 %v918_v29, 0.0 }
  0xd5   : > { %v723_v63 = vpop.permute.xlu0 %722 }
  0xd6   : > { %v844_v7 = vmul.f32 %v3366_v51, %v723_v63  ;;  %3090 = vset.pattern.permute.xlu1 %v3119_v5  ;;  %v913_v17 = vadd.f32 %v3375_v56, %v874_v57 }
  0xd7   : > { %790 = vperm.xlu1 %3090, %v302_v28   ;;  %v546_v12 = vpop.permute.xlu1 %545 }
  0xd8   : > { %v876_v14 = vadd.f32 %v844_v7, %v679_v2  ;;  %v945_v22 = vmax.f32 %v913_v17, 0.0  ;;  %v652_v43 = vmul.f32 %v3356_v47, %v546_v12 }
  0xd9   : > { %v731_v32 = vpop.permute.xlu0 %730 }
  0xda   : > { %v846_v38 = vmul.f32 %v3366_v51, %v731_v32  ;;  %2805 = vmatmul.mubr.f32.vlgmr.msra.gmra.mxu0 %v945_v22  ;;  %v915_v28 = vadd.f32 %v3375_v56, %v876_v14  ;;  %v684_v60 = vadd.f32 %v652_v43, %v487_v55  ;;  %v306_v32 = vld [vmem:[%s3178_s30 + $0xc0] sm:$0xff]  ;;  %v492_v55 = vmul.f32 %v3349_v45, %v3391_v8 }
  0xdb   : > { %3091 = vset.pattern.permute.xlu1 %v3117_v0  ;;  %v550_v39 = vpop.permute.xlu1 %549  ;;  %2807 = vmatprep.mubr.f32.mxu0 %v946_v15 }
  0xdc   : > { %v878_v40 = vadd.f32 %v846_v38, %v681_v36  ;;  %427 = vperm.xlu1 %3091, %v304_v35   ;;  %v947_v41 = vmax.f32 %v915_v28, 0.0  ;;  %v653_v50 = vmul.f32 %v3356_v47, %v550_v39 }
  0xdd   : > { %v739_v44 = vpop.permute.xlu0 %738 }
  0xde   : > { %v848_v52 = vmul.f32 %v3366_v51, %v739_v44  ;;  %2808 = vmatmul.mubr.f32.gmra.mxu0 %v947_v41  ;;  %v917_v48 = vadd.f32 %v3375_v56, %v878_v40  ;;  %v685_v2 = vadd.f32 %v653_v50, %v488_v62 }
  0xdf   : > { %2810 = vmatprep.mubr.f32.mxu0 %v948_v46 }
  0xe0   : > { %v880_v42 = vadd.f32 %v848_v52, %v683_v49  ;;  %3092 = vset.pattern.permute.xlu1 %v3118_v3  ;;  %v743_v57 = vpop.permute.xlu1 %742  ;;  %v949_v59 = vmax.f32 %v917_v48, 0.0  ;;  %v308_v52 = vld [vmem:[%s3178_s30 + $0xd0] sm:$0xff] }
  0xe1   : > { %v849_v61 = vmul.f32 %v3366_v51, %v743_v57  ;;  %601 = vperm.xlu1 %3092, %v304_v35   ;;  %v747_v63 = vpop.permute.xlu0 %746 }
  0xe2   : > { %v850_v4 = vmul.f32 %v3366_v51, %v747_v63  ;;  %2811 = vmatmul.mubr.f32.gmra.mxu0 %v949_v59  ;;  %v919_v53 = vadd.f32 %v3375_v56, %v880_v42 }
  0xe3   : > { %v881_v7 = vadd.f32 %v849_v61, %v684_v60  ;;  %2813 = vmatprep.mubr.f32.mxu0 %v950_v54 }
  0xe4   : > { %v882_v1 = vadd.f32 %v850_v4, %v685_v2  ;;  %v951_v17 = vmax.f32 %v919_v53, 0.0 }
  0xe5   : > { %605 = vperm.xlu1 %3092, %v3250_v20   ;;  %v368_v9 = vpop.permute.xlu1 %367  ;;  %v920_v12 = vadd.f32 %v3375_v56, %v881_v7  ;;  %v490_v20 = vmul.f32 %v3349_v45, %v3388_v6  ;;  %v755_v36 = vpop.permute.xlu0 %754 }
  0xe6   : > { %2814 = vmatmul.mubr.f32.gmra.mxu0 %v951_v17  ;;  %v921_v13 = vadd.f32 %v3375_v56, %v882_v1  ;;  %v852_v38 = vmul.f32 %v3366_v51, %v755_v36 }
  0xe7   : > { %v952_v14 = vmax.f32 %v920_v12, 0.0  ;;  %v310_v12 = vld [vmem:[%s3178_s30 + $0xe0] sm:$0xff] }
  0xe8   : > { %v953_v22 = vmax.f32 %v921_v13, 0.0 }
  0xe9   : > { %3093 = vset.pattern.permute.xlu1 %v3119_v5  ;;  %2816 = vmatprep.mubr.f32.mxu0 %v952_v14  ;;  %v763_v62 = vpop.permute.xlu0 %762 }
  0xea   : > { %798 = vperm.xlu1 %3093, %v304_v35   ;;  %v554_v25 = vpop.permute.xlu1 %553  ;;  %2817 = vmatmul.mubr.f32.gmra.mxu0 %v953_v22  ;;  %v489_v35 = vmul.f32 %v3349_v45, %v368_v9  ;;  %v854_v57 = vmul.f32 %v3366_v51, %v763_v62  ;;  %v494_v22 = vmul.f32 %v3349_v45, %v3394_v10 }
  0xeb   : > { %v654_v37 = vmul.f32 %v3356_v47, %v554_v25 }
  0xed   : > { %v686_v40 = vadd.f32 %v654_v37, %v489_v35  ;;  %v771_v13 = vpop.permute.xlu0 %770 }
  0xee   : > { %3094 = vset.pattern.permute.xlu1 %v3117_v0  ;;  %v558_v15 = vpop.permute.xlu1 %557 }
  0xef   : > { %v655_v18 = vmul.f32 %v3356_v47, %v558_v15  ;;  %437 = vperm.xlu1 %3094, %v306_v32  }
  0xf1   : > { %v687_v28 = vadd.f32 %v655_v18, %v490_v20 }
  0xf3   : > { %v884_v39 = vadd.f32 %v852_v38, %v687_v28  ;;  %3095 = vset.pattern.permute.xlu1 %v3118_v3  ;;  %v751_v58 = vpop.permute.xlu1 %750 }
  0xf4   : > { %v851_v41 = vmul.f32 %v3366_v51, %v751_v58  ;;  %609 = vperm.xlu1 %3095, %v306_v32   ;;  %v2597_v58 = vld [vmem:[%s4339_s3 + $0xf8] sm:$0xff] }
  0xf5   : > { %v923_v43 = vadd.f32 %v3375_v56, %v884_v39  ;;  %2852 = vmatprep.subr.mxu1 %v2597_v58 }
  0xf6   : > { %v883_v6 = vadd.f32 %v851_v41, %v686_v40 }
  0xf7   : > { %v955_v49 = vmax.f32 %v923_v43, 0.0  ;;  %v312_v43 = vld [vmem:[%s3178_s30 + $0xf0] sm:$0xff]  ;;  %s3884_s30 = scalar_lea.vmem %s4343_s7, %s2574_s27 }
  0xf8   : > { %613 = vperm.xlu1 %3095, %v3261_v24   ;;  %v378_v44 = vpop.permute.xlu1 %377  ;;  %v922_v46 = vadd.f32 %v3375_v56, %v883_v6 }
  0xf9   : > { %v491_v60 = vmul.f32 %v3349_v45, %v378_v44  ;;  %v779_v44 = vpop.permute.xlu0 %778 }
  0xfa   : > { %v954_v29 = vmax.f32 %v922_v46, 0.0  ;;  %v496_v46 = vmul.f32 %v3349_v45, %v3397_v11 }
  0xfc   : > { %3096 = vset.pattern.permute.xlu1 %v3119_v5  ;;  %2819 = vmatprep.mubr.f32.mxu0 %v954_v29 }
  0xfd   : > { %806 = vperm.xlu1 %3096, %v306_v32   ;;  %v562_v50 = vpop.permute.xlu1 %561  ;;  %2820 = vmatmul.mubr.f32.gmra.mxu0 %v955_v49  ;;  %v856_v32 = vmul.f32 %v3366_v51, %v771_v13 }
  0xfe   : > { %v656_v42 = vmul.f32 %v3356_v47, %v562_v50  ;;  %v858_v50 = vmul.f32 %v3366_v51, %v779_v44  ;;  %v2584_v44 = vld [vmem:[%s4339_s3 + $0x90] sm:$0xff] }
 0x100   : > { %v688_v54 = vadd.f32 %v656_v42, %v491_v60 }
 0x101   : > { %3097 = vset.pattern.permute.xlu1 %v3117_v0  ;;  %v566_v48 = vpop.permute.xlu1 %565 }
 0x102   : > { %v657_v24 = vmul.f32 %v3356_v47, %v566_v48  ;;  %447 = vperm.xlu1 %3097, %v308_v52  }
 0x104   : > { %v689_v59 = vadd.f32 %v657_v24, %v492_v55 }
 0x106   : > { %v886_v61 = vadd.f32 %v854_v57, %v689_v59  ;;  %3098 = vset.pattern.permute.xlu1 %v3118_v3  ;;  %v759_v63 = vpop.permute.xlu1 %758 }
 0x107   : > { %v853_v2 = vmul.f32 %v3366_v51, %v759_v63  ;;  %617 = vperm.xlu1 %3098, %v308_v52  }
 0x108   : > { %v925_v4 = vadd.f32 %v3375_v56, %v886_v61 }
 0x109   : > { %v885_v8 = vadd.f32 %v853_v2, %v688_v54  ;;  %v2594_v54 = vld [vmem:[%s4339_s3 + $0xe0] sm:$0xff] }
 0x10a   : > { %v957_v17 = vmax.f32 %v925_v4, 0.0 }
 0x10b   : > { %621 = vperm.xlu1 %3098, %v3272_v27   ;;  %v388_v53 = vpop.permute.xlu1 %387  ;;  %v924_v7 = vadd.f32 %v3375_v56, %v885_v8  ;;  %v498_v8 = vmul.f32 %v3349_v45, %v3400_v16 }
 0x10c   : > { %v493_v20 = vmul.f32 %v3349_v45, %v388_v53  ;;  %v2593_v53 = vld [vmem:[%s4339_s3 + $0xd8] sm:$0xff] }
 0x10d   : > { %v956_v1 = vmax.f32 %v924_v7, 0.0 }
 0x10f   : > { %3099 = vset.pattern.permute.xlu1 %v3119_v5  ;;  %2822 = vmatprep.mubr.f32.mxu0 %v956_v1 }
 0x110   : > { %814 = vperm.xlu1 %3099, %v308_v52   ;;  %v570_v9 = vpop.permute.xlu1 %569  ;;  %2823 = vmatmul.mubr.f32.gmra.mxu0 %v957_v17 }
 0x111   : > { %v658_v25 = vmul.f32 %v3356_v47, %v570_v9  ;;  %v2592_v9 = vld [vmem:[%s4339_s3 + $0xd0] sm:$0xff] }
 0x113   : > { %v690_v37 = vadd.f32 %v658_v25, %v493_v20  ;;  %v2590_v25 = vld [vmem:[%s4339_s3 + $0xc0] sm:$0xff]  ;;  %v2589_v20 = vld [vmem:[%s4339_s3 + $0xb8] sm:$0xff] }
 0x114   : > { %3100 = vset.pattern.permute.xlu1 %v3117_v0  ;;  %v574_v14 = vpop.permute.xlu1 %573 }
 0x115   : > { %v659_v27 = vmul.f32 %v3356_v47, %v574_v14  ;;  %457 = vperm.xlu1 %3100, %v310_v12   ;;  %v2591_v14 = vld [vmem:[%s4339_s3 + $0xc8] sm:$0xff] }
 0x117   : > { %v691_v15 = vadd.f32 %v659_v27, %v494_v22 }
 0x119   : > { %v888_v18 = vadd.f32 %v856_v32, %v691_v15  ;;  %3101 = vset.pattern.permute.xlu1 %v3118_v3  ;;  %v767_v36 = vpop.permute.xlu1 %766 }
 0x11a   : > { %v855_v38 = vmul.f32 %v3366_v51, %v767_v36  ;;  %625 = vperm.xlu1 %3101, %v310_v12  }
 0x11b   : > { %v927_v28 = vadd.f32 %v3375_v56, %v888_v18 }
 0x11c   : > { %v887_v10 = vadd.f32 %v855_v38, %v690_v37  ;;  %v2588_v37 = vld [vmem:[%s4339_s3 + $0xb0] sm:$0xff] }
 0x11d   : > { %v959_v41 = vmax.f32 %v927_v28, 0.0  ;;  %v2587_v28 = vld [vmem:[%s4339_s3 + $0xa8] sm:$0xff] }
 0x11e   : > { %629 = vperm.xlu1 %3101, %v3283_v30   ;;  %v398_v35 = vpop.permute.xlu1 %397  ;;  %v926_v39 = vadd.f32 %v3375_v56, %v887_v10 }
 0x11f   : > { %v495_v48 = vmul.f32 %v3349_v45, %v398_v35 }
 0x120   : > { %v958_v40 = vmax.f32 %v926_v39, 0.0  ;;  %v2586_v39 = vld [vmem:[%s4339_s3 + $0xa0] sm:$0xff] }
 0x122   : > { %3102 = vset.pattern.permute.xlu1 %v3119_v5  ;;  %2825 = vmatprep.mubr.f32.mxu0 %v958_v40 }
 0x123   : > { %822 = vperm.xlu1 %3102, %v310_v12   ;;  %v578_v6 = vpop.permute.xlu1 %577  ;;  %2826 = vmatmul.mubr.f32.gmra.mxu0 %v959_v41 }
 0x124   : > { %v660_v49 = vmul.f32 %v3356_v47, %v578_v6  ;;  %v500_v6 = vmul.f32 %v3349_v45, %v3403_v19 }
 0x126   : > { %v692_v62 = vadd.f32 %v660_v49, %v495_v48  ;;  %v2583_v49 = vld [vmem:[%s4339_s3 + $0x88] sm:$0xff]  ;;  %v2582_v48 = vld [vmem:[%s4339_s3 + $0x80] sm:$0xff] }
 0x127   : > { %3103 = vset.pattern.permute.xlu1 %v3117_v0  ;;  %v582_v30 = vpop.permute.xlu1 %581 }
 0x128   : > { %v661_v29 = vmul.f32 %v3356_v47, %v582_v30  ;;  %467 = vperm.xlu1 %3103, %v312_v43  }
 0x12a   : > { %v693_v52 = vadd.f32 %v661_v29, %v496_v46 }
 0x12c   : > { %v890_v55 = vadd.f32 %v858_v50, %v693_v52  ;;  %3104 = vset.pattern.permute.xlu1 %v3118_v3  ;;  %v775_v24 = vpop.permute.xlu1 %774  ;;  %v2596_v3 = vld [vmem:[%s4339_s3 + $0xf0] sm:$0xff] }
 0x12d   : > { %v857_v0 = vmul.f32 %v3366_v51, %v775_v24  ;;  %633 = vperm.xlu1 %3104, %v312_v43  }
 0x12e   : > { %v929_v11 = vadd.f32 %v3375_v56, %v890_v55 }
 0x12f   : > { %v889_v42 = vadd.f32 %v857_v0, %v692_v62 }
 0x130   : > { %v961_v61 = vmax.f32 %v929_v11, 0.0 }
 0x131   : > { %637 = vperm.xlu1 %3104, %v3294_v33   ;;  %v408_v57 = vpop.permute.xlu1 %407  ;;  %v928_v59 = vadd.f32 %v3375_v56, %v889_v42  ;;  %v2595_v33 = vld [vmem:[%s4339_s3 + $0xe8] sm:$0xff] }
 0x132   : > { %v497_v16 = vmul.f32 %v3349_v45, %v408_v57 }
 0x133   : > { %v960_v60 = vmax.f32 %v928_v59, 0.0 }
 0x135   : > { %3106 = vset.pattern.permute.xlu1 %v3119_v5  ;;  %2828 = vmatprep.mubr.f32.mxu1 %v960_v60  ;;  %v787_v5 = vpop.permute.xlu0 %786 }
 0x136   : > { %830 = vperm.xlu1 %3106, %v312_v43   ;;  %v586_v63 = vpop.permute.xlu1 %585  ;;  %2829 = vmatmul.mubr.f32.vlgmr.msra.gmra.mxu1 %v961_v61  ;;  %v860_v1 = vmul.f32 %v3366_v51, %v787_v5 }
 0x137   : > { %2853 = vmatpush3.msra.mxu1 %v2597_v58  ;;  %v662_v7 = vmul.f32 %v3356_v47, %v586_v63  ;;  %v2585_v58 = vld [vmem:[%s4339_s3 + $0x98] sm:$0xff]  ;;  %v502_v63 = vmul.f32 %v3349_v45, %v3406_v21 }
 0x138   : > { %2854 = vmatprep.subr.mxu1 %v2596_v3 }
 0x139   : > { %2855 = vmatpush3.msra.mxu1 %v2596_v3  ;;  %v694_v22 = vadd.f32 %v662_v7, %v497_v16  ;;  %v795_v40 = vpop.permute.xlu0 %794 }
 0x13a   : > { %v590_v2 = vpop.permute.xlu1 %589  ;;  %2856 = vmatprep.subr.mxu1 %v2595_v33  ;;  %v862_v46 = vmul.f32 %v3366_v51, %v795_v40 }
 0x13b   : > { %v663_v4 = vmul.f32 %v3356_v47, %v590_v2  ;;  %2857 = vmatpush3.msra.mxu1 %v2595_v33 }
 0x13c   : > { %2858 = vmatprep.subr.mxu1 %v2594_v54 }
 0x13d   : > { %v695_v17 = vadd.f32 %v663_v4, %v498_v8  ;;  %2859 = vmatpush3.msra.mxu1 %v2594_v54  ;;  %v803_v61 = vpop.permute.xlu0 %802 }
 0x13e   : > { %2860 = vmatprep.subr.mxu1 %v2593_v53  ;;  %v864_v5 = vmul.f32 %v3366_v51, %v803_v61 }
 0x13f   : > { %v892_v12 = vadd.f32 %v860_v1, %v695_v17  ;;  %v783_v13 = vpop.permute.xlu1 %782  ;;  %2861 = vmatpush3.msra.mxu1 %v2593_v53 }
 0x140   : > { %v859_v27 = vmul.f32 %v3366_v51, %v783_v13  ;;  %2862 = vmatprep.subr.mxu1 %v2592_v9 }
 0x141   : > { %2863 = vmatpush3.msra.mxu1 %v2592_v9  ;;  %v931_v15 = vadd.f32 %v3375_v56, %v892_v12 }
 0x142   : > { %v891_v32 = vadd.f32 %v859_v27, %v694_v22  ;;  %2864 = vmatprep.subr.mxu1 %v2591_v14  ;;  %v811_v22 = vpop.permute.xlu0 %810 }
 0x143   : > { %2865 = vmatpush3.msra.mxu1 %v2591_v14  ;;  %v963_v10 = vmax.f32 %v931_v15, 0.0 }
 0x144   : > { %v418_v18 = vpop.permute.xlu1 %417  ;;  %v930_v36 = vadd.f32 %v3375_v56, %v891_v32  ;;  %2866 = vmatprep.subr.mxu1 %v2590_v25 }
 0x145   : > { %2867 = vmatpush3.msra.mxu1 %v2590_v25  ;;  %v499_v19 = vmul.f32 %v3349_v45, %v418_v18  ;;  %v504_v25 = vmul.f32 %v3349_v45, %v3409_v23 }
 0x146   : > { %v962_v38 = vmax.f32 %v930_v36, 0.0  ;;  %2868 = vmatprep.subr.mxu1 %v2589_v20 }
 0x147   : > { %2869 = vmatpush3.msra.mxu1 %v2589_v20  ;;  %v866_v20 = vmul.f32 %v3366_v51, %v811_v22 }
 0x148   : > { %2831 = vmatprep.mubr.f32.mxu1 %v962_v38  ;;  %2870 = vmatprep.subr.mxu1 %v2588_v37 }
 0x149   : > { %v594_v35 = vpop.permute.xlu1 %593  ;;  %2832 = vmatmul.mubr.f32.gmra.mxu1 %v963_v10 }
 0x14a   : > { %2871 = vmatpush3.msra.mxu1 %v2588_v37  ;;  %v664_v30 = vmul.f32 %v3356_v47, %v594_v35 }
 0x14b   : > { %2872 = vmatprep.subr.mxu1 %v2587_v28 }
 0x14c   : > { %2873 = vmatpush3.msra.mxu1 %v2587_v28  ;;  %v696_v55 = vadd.f32 %v664_v30, %v499_v19  ;;  %v506_v30 = vmul.f32 %v3349_v45, %v3412_v26 }
 0x14d   : > { %v598_v41 = vpop.permute.xlu1 %597  ;;  %2874 = vmatprep.subr.mxu1 %v2586_v39 }
 0x14e   : > { %v665_v43 = vmul.f32 %v3356_v47, %v598_v41  ;;  %2875 = vmatpush3.msra.mxu1 %v2586_v39 }
 0x14f   : > { %2876 = vmatprep.subr.mxu1 %v2585_v58 }
 0x150   : > { %v697_v29 = vadd.f32 %v665_v43, %v500_v6  ;;  %2877 = vmatpush3.msra.mxu1 %v2585_v58  ;;  %v819_v43 = vpop.permute.xlu0 %818 }
 0x151   : > { %2878 = vmatprep.subr.mxu1 %v2584_v44 }
 0x152   : > { %v894_v50 = vadd.f32 %v862_v46, %v697_v29  ;;  %v791_v52 = vpop.permute.xlu1 %790  ;;  %2879 = vmatpush3.msra.mxu1 %v2584_v44 }
 0x153   : > { %v861_v24 = vmul.f32 %v3366_v51, %v791_v52  ;;  %2880 = vmatprep.subr.mxu1 %v2583_v49 }
 0x154   : > { %2881 = vmatpush3.msra.mxu1 %v2583_v49  ;;  %v933_v0 = vadd.f32 %v3375_v56, %v894_v50  ;;  %v868_v49 = vmul.f32 %v3366_v51, %v819_v43 }
 0x155   : > { %v893_v62 = vadd.f32 %v861_v24, %v696_v55  ;;  %2882 = vmatprep.subr.mxu1 %v2582_v48 }
 0x156   : > { %2883 = vmatpush3.msra.mxu1 %v2582_v48  ;;  %v965_v59 = vmax.f32 %v933_v0, 0.0 }
 0x157   : > { %v428_v42 = vpop.permute.xlu1 %427  ;;  %v932_v11 = vadd.f32 %v3375_v56, %v893_v62 }
 0x158   : > { %v501_v8 = vmul.f32 %v3349_v45, %v428_v42 }
 0x159   : > { %v964_v57 = vmax.f32 %v932_v11, 0.0 }
 0x15b   : > { %2834 = vmatprep.mubr.f32.mxu1 %v964_v57 }
 0x15c   : > { %v602_v60 = vpop.permute.xlu1 %601  ;;  %2835 = vmatmul.mubr.f32.gmra.mxu1 %v965_v59 }
 0x15d   : > { %v666_v54 = vmul.f32 %v3356_v47, %v602_v60  ;;  %v827_v60 = vpop.permute.xlu0 %826 }
 0x15f   : > { %v698_v7 = vadd.f32 %v666_v54, %v501_v8  ;;  %v870_v54 = vmul.f32 %v3366_v51, %v827_v60 }
 0x160   : > { %v606_v3 = vpop.permute.xlu1 %605 }
 0x161   : > { %v667_v33 = vmul.f32 %v3356_v47, %v606_v3  ;;  %v508_v3 = vmul.f32 %v3349_v45, %v3416_v31 }
 0x163   : > { %v699_v2 = vadd.f32 %v667_v33, %v502_v63 }
 0x165   : > { %v896_v4 = vadd.f32 %v864_v5, %v699_v2  ;;  %v799_v53 = vpop.permute.xlu1 %798 }
 0x166   : > { %v863_v1 = vmul.f32 %v3366_v51, %v799_v53 }
 0x167   : > { %v935_v9 = vadd.f32 %v3375_v56, %v896_v4 }
 0x168   : > { %v895_v17 = vadd.f32 %v863_v1, %v698_v7 }
 0x169   : > { %v967_v13 = vmax.f32 %v935_v9, 0.0 }
 0x16a   : > { %v438_v16 = vpop.permute.xlu1 %437  ;;  %v934_v21 = vadd.f32 %v3375_v56, %v895_v17 }
 0x16b   : > { %v503_v36 = vmul.f32 %v3349_v45, %v438_v16 }
 0x16c   : > { %v966_v12 = vmax.f32 %v934_v21, 0.0 }
 0x16e   : > { %2837 = vmatprep.mubr.f32.mxu1 %v966_v12 }
 0x16f   : > { %v610_v14 = vpop.permute.xlu1 %609  ;;  %2838 = vmatmul.mubr.f32.gmra.mxu1 %v967_v13 }
 0x170   : > { %v668_v15 = vmul.f32 %v3356_v47, %v610_v14 }
 0x172   : > { %v700_v10 = vadd.f32 %v668_v15, %v503_v36  ;;  %v510_v15 = vmul.f32 %v3349_v45, %v3419_v34  ;;  %v3638_v34 = vld [vmem:[%s4340_s4] ss:$0 sm:$0xff] }
 0x173   : > { %v614_v27 = vpop.permute.xlu1 %613 }
 0x174   : > { %v669_v32 = vmul.f32 %v3356_v47, %v614_v27 }
 0x176   : > { %v701_v18 = vadd.f32 %v669_v32, %v504_v25  ;;  %v835_v25 = vpop.permute.xlu0 %834 }
 0x178   : > { %v898_v37 = vadd.f32 %v866_v20, %v701_v18  ;;  %v807_v38 = vpop.permute.xlu1 %806 }
 0x179   : > { %v865_v28 = vmul.f32 %v3366_v51, %v807_v38 }
 0x17a   : > { %v937_v39 = vadd.f32 %v3375_v56, %v898_v37  ;;  %v872_v37 = vmul.f32 %v3366_v51, %v835_v25  ;;  %v2613_v25 = vld [vmem:[%s4339_s3 + $0x168] sm:$0xff] }
 0x17b   : > { %v897_v35 = vadd.f32 %v865_v28, %v700_v10 }
 0x17c   : > { %v969_v41 = vmax.f32 %v937_v39, 0.0 }
 0x17d   : > { %v448_v58 = vpop.permute.xlu1 %447  ;;  %v936_v23 = vadd.f32 %v3375_v56, %v897_v35 }
 0x17e   : > { %v505_v50 = vmul.f32 %v3349_v45, %v448_v58 }
 0x17f   : > { %v968_v40 = vmax.f32 %v936_v23, 0.0 }
 0x181   : > { %2840 = vmatprep.mubr.f32.mxu1 %v968_v40 }
 0x182   : > { %v618_v6 = vpop.permute.xlu1 %617  ;;  %2841 = vmatmul.mubr.f32.gmra.mxu1 %v969_v41 }
 0x183   : > { %v670_v29 = vmul.f32 %v3356_v47, %v618_v6 }
 0x185   : > { %v702_v55 = vadd.f32 %v670_v29, %v505_v50 }
 0x186   : > { %v622_v44 = vpop.permute.xlu1 %621 }
 0x187   : > { %v671_v46 = vmul.f32 %v3356_v47, %v622_v44 }
 0x189   : > { %v703_v19 = vadd.f32 %v671_v46, %v506_v30 }
 0x18b   : > { %v900_v52 = vadd.f32 %v868_v49, %v703_v19  ;;  %v815_v48 = vpop.permute.xlu1 %814 }
 0x18c   : > { %v867_v24 = vmul.f32 %v3366_v51, %v815_v48 }
 0x18d   : > { %v939_v0 = vadd.f32 %v3375_v56, %v900_v52 }
 0x18e   : > { %v899_v62 = vadd.f32 %v867_v24, %v702_v55 }
 0x18f   : > { %v971_v57 = vmax.f32 %v939_v0, 0.0 }
 0x190   : > { %v458_v42 = vpop.permute.xlu1 %457  ;;  %v938_v26 = vadd.f32 %v3375_v56, %v899_v62 }
 0x191   : > { %v507_v2 = vmul.f32 %v3349_v45, %v458_v42 }
 0x192   : > { %v970_v11 = vmax.f32 %v938_v26, 0.0 }
 0x194   : > { %2843 = vmatprep.mubr.f32.mxu1 %v970_v11 }
 0x195   : > { %v626_v59 = vpop.permute.xlu1 %625  ;;  %2844 = vmatmul.mubr.f32.gmra.mxu1 %v971_v57 }
 0x196   : > { %v672_v33 = vmul.f32 %v3356_v47, %v626_v59 }
 0x198   : > { %v704_v7 = vadd.f32 %v672_v33, %v507_v2 }
 0x199   : > { %v630_v61 = vpop.permute.xlu1 %629 }
 0x19a   : > { %v673_v63 = vmul.f32 %v3356_v47, %v630_v61  ;;  %v2806_v8 = vpop.f32.mrf.mxu0 }
 0x19b   : > { %v1071_v44 = vadd.f32 %v2806_v8, %v3638_v34 }
 0x19c   : > { %v705_v5 = vadd.f32 %v673_v63, %v508_v3  ;;  %v1065_v17 = vpop.f32.mrf.mxu0 }
 0x19d   : > { %v1066_v6 = vadd.f32 %v3638_v34, %v1065_v17  ;;  %v1225_v49 = vmax.f32 %v1071_v44, 0.0 }
 0x19e   : > { %v902_v4 = vadd.f32 %v870_v54, %v705_v5  ;;  %v823_v53 = vpop.permute.xlu1 %822  ;;  %v2809_v12 = vpop.f32.mrf.mxu0 }
 0x19f   : > { %v869_v1 = vmul.f32 %v3366_v51, %v823_v53  ;;  %v1224_v29 = vmax.f32 %v1066_v6, 0.0  ;;  %v1081_v19 = vadd.f32 %v2809_v12, %v3638_v34  ;;  %v2602_v6 = vld [vmem:[%s4339_s3 + $0x110] sm:$0xff] }
 0x1a0   : > { %v941_v16 = vadd.f32 %v3375_v56, %v902_v4  ;;  %v1075_v27 = vpop.f32.mrf.mxu0 }
 0x1a1   : > { %v901_v9 = vadd.f32 %v869_v1, %v704_v7 }
 0x1a2   : > { %v973_v14 = vmax.f32 %v941_v16, 0.0  ;;  %v2812_v20 = vpop.f32.mrf.mxu0  ;;  %v2615_v16 = vld [vmem:[%s4339_s3 + $0x178] sm:$0xff] }
 0x1a3   : > { %v468_v31 = vpop.permute.xlu1 %467  ;;  %v940_v21 = vadd.f32 %v3375_v56, %v901_v9  ;;  %v1091_v55 = vadd.f32 %v2812_v20, %v3638_v34  ;;  %2932 = vmatprep.subr.mxu0 %v2615_v16  ;;  %v2610_v20 = vld [vmem:[%s4339_s3 + $0x150] sm:$0xff] }
 0x1a4   : > { %v509_v10 = vmul.f32 %v3349_v45, %v468_v31  ;;  %v1085_v28 = vpop.f32.mrf.mxu0  ;;  %2933 = vmatpush3.msra.mxu0 %v2615_v16 }
 0x1a5   : > { %v972_v13 = vmax.f32 %v940_v21, 0.0  ;;  %v1086_v48 = vadd.f32 %v3638_v34, %v1085_v28  ;;  %v1229_v26 = vmax.f32 %v1091_v55, 0.0 }
 0x1a6   : > { %v2815_v41 = vpop.f32.mrf.mxu0 }
 0x1a7   : > { %2846 = vmatprep.mubr.f32.mxu1 %v972_v13  ;;  %v1228_v62 = vmax.f32 %v1086_v48, 0.0  ;;  %v1101_v11 = vadd.f32 %v2815_v41, %v3638_v34  ;;  %v2604_v41 = vld [vmem:[%s4339_s3 + $0x120] sm:$0xff] }
 0x1a8   : > { %v634_v22 = vpop.permute.xlu1 %633  ;;  %2847 = vmatmul.mubr.f32.gmra.mxu1 %v973_v14  ;;  %v1095_v30 = vpop.f32.mrf.mxu0 }
 0x1a9   : > { %v674_v36 = vmul.f32 %v3356_v47, %v634_v22  ;;  %v1096_v0 = vadd.f32 %v3638_v34, %v1095_v30  ;;  %v1231_v61 = vmax.f32 %v1101_v11, 0.0  ;;  %v2614_v22 = vld [vmem:[%s4339_s3 + $0x170] sm:$0xff] }
 0x1aa   : > { %v2818_v50 = vpop.f32.mrf.mxu0  ;;  %2934 = vmatprep.subr.mxu0 %v2614_v22 }
 0x1ab   : > { %v706_v58 = vadd.f32 %v674_v36, %v509_v10  ;;  %v1230_v57 = vmax.f32 %v1096_v0, 0.0  ;;  %v1111_v3 = vadd.f32 %v2818_v50, %v3638_v34  ;;  %2935 = vmatpush3.msra.mxu0 %v2614_v22  ;;  %v2608_v36 = vld [vmem:[%s4339_s3 + $0x140] sm:$0xff]  ;;  %v2606_v10 = vld [vmem:[%s4339_s3 + $0x130] sm:$0xff] }
 0x1ac   : > { %v638_v32 = vpop.permute.xlu1 %637  ;;  %v1105_v24 = vpop.f32.mrf.mxu0  ;;  %2936 = vmatprep.subr.mxu0 %v2613_v25 }
 0x1ad   : > { %v675_v18 = vmul.f32 %v3356_v47, %v638_v32  ;;  %v1106_v59 = vadd.f32 %v3638_v34, %v1105_v24  ;;  %v1233_v54 = vmax.f32 %v1111_v3, 0.0  ;;  %2937 = vmatpush3.msra.mxu0 %v2613_v25  ;;  %v2612_v32 = vld [vmem:[%s4339_s3 + $0x160] sm:$0xff] }
 0x1ae   : > { %2938 = vmatprep.subr.mxu0 %v2612_v32 }
 0x1af   : > { %v707_v38 = vadd.f32 %v675_v18, %v510_v15  ;;  %v1232_v63 = vmax.f32 %v1106_v59, 0.0  ;;  %v2611_v15 = vld [vmem:[%s4339_s3 + $0x158] sm:$0xff]  ;;  %2939 = vmatpush3.msra.mxu0 %v2612_v32  ;;  %v2609_v18 = vld [vmem:[%s4339_s3 + $0x148] sm:$0xff] }
 0x1b0   : > { %2940 = vmatprep.subr.mxu0 %v2611_v15 }
 0x1b1   : > { %v904_v35 = vadd.f32 %v872_v37, %v707_v38  ;;  %v831_v39 = vpop.permute.xlu1 %830  ;;  %2941 = vmatpush3.msra.mxu0 %v2611_v15  ;;  %v2607_v37 = vld [vmem:[%s4339_s3 + $0x138] sm:$0xff] }
 0x1b2   : > { %v871_v23 = vmul.f32 %v3366_v51, %v831_v39  ;;  %v1076_v51 = vadd.f32 %v3638_v34, %v1075_v27  ;;  %2942 = vmatprep.subr.mxu0 %v2610_v20  ;;  %v2605_v39 = vld [vmem:[%s4339_s3 + $0x128] sm:$0xff] }
 0x1b3   : > { %v943_v47 = vadd.f32 %v3375_v56, %v904_v35  ;;  %2943 = vmatpush3.msra.mxu0 %v2610_v20 }
 0x1b4   : > { %v903_v40 = vadd.f32 %v871_v23, %v706_v58  ;;  %v1226_v52 = vmax.f32 %v1076_v51, 0.0  ;;  %2944 = vmatprep.subr.mxu0 %v2609_v18 }
 0x1b5   : > { %v975_v46 = vmax.f32 %v943_v47, 0.0  ;;  %2945 = vmatpush3.msra.mxu0 %v2609_v18  ;;  %v2603_v47 = vld [vmem:[%s4339_s3 + $0x118] sm:$0xff] }
 0x1b6   : > { %v942_v43 = vadd.f32 %v3375_v56, %v903_v40  ;;  %v1227_v56 = vmax.f32 %v1081_v19, 0.0  ;;  %2946 = vmatprep.subr.mxu0 %v2608_v36 }
 0x1b7   : > { %2947 = vmatpush3.msra.mxu0 %v2608_v36 }
 0x1b8   : > { %v974_v45 = vmax.f32 %v942_v43, 0.0  ;;  %2948 = vmatprep.subr.mxu0 %v2607_v37  ;;  %v2601_v43 = vld [vmem:[%s4339_s3 + $0x108] sm:$0xff] }
 0x1b9   : > { %2949 = vmatpush3.msra.mxu0 %v2607_v37 }
 0x1ba   : > { %2849 = vmatprep.mubr.f32.mxu1 %v974_v45  ;;  %2950 = vmatprep.subr.mxu0 %v2606_v10  ;;  %v2600_v45 = vld [vmem:[%s4339_s3 + $0x100] sm:$0xff] }
 0x1bb   : > { %2850 = vmatmul.mubr.f32.gmra.mxu1 %v975_v46  ;;  %2951 = vmatpush3.msra.mxu0 %v2606_v10 }
 0x1bc   : > { %2884 = vmatprep.mubr.f32.mxu1 %v1224_v29  ;;  %2952 = vmatprep.subr.mxu0 %v2605_v39 }
 0x1bd   : > { %v2821_v42 = vpop.f32.mrf.mxu0  ;;  %2953 = vmatpush3.msra.mxu0 %v2605_v39 }
 0x1be   : > { %v1121_v5 = vadd.f32 %v2821_v42, %v3638_v34  ;;  %2954 = vmatprep.subr.mxu0 %v2604_v41 }
 0x1bf   : > { %2885 = vmatmul.mubr.f32.vlgmr.msra.gmra.mxu1 %v1225_v49  ;;  %v1115_v60 = vpop.f32.mrf.mxu0  ;;  %2955 = vmatpush3.msra.mxu0 %v2604_v41 }
 0x1c0   : > { %2887 = vmatprep.mubr.f32.mxu1 %v1226_v52  ;;  %v1116_v33 = vadd.f32 %v3638_v34, %v1115_v60  ;;  %v1235_v4 = vmax.f32 %v1121_v5, 0.0  ;;  %2956 = vmatprep.subr.mxu0 %v2603_v47 }
 0x1c1   : > { %2957 = vmatpush3.msra.mxu0 %v2603_v47 }
 0x1c2   : > { %v1234_v2 = vmax.f32 %v1116_v33, 0.0  ;;  %2958 = vmatprep.subr.mxu0 %v2602_v6 }
 0x1c3   : > { %2888 = vmatmul.mubr.f32.gmra.mxu1 %v1227_v56  ;;  %2959 = vmatpush3.msra.mxu0 %v2602_v6 }
 0x1c4   : > { %2890 = vmatprep.mubr.f32.mxu1 %v1228_v62  ;;  %2960 = vmatprep.subr.mxu0 %v2601_v43 }
 0x1c5   : > { %2961 = vmatpush3.msra.mxu0 %v2601_v43 }
 0x1c6   : > { %2962 = vmatprep.subr.mxu0 %v2600_v45 }
 0x1c7   : > { %2891 = vmatmul.mubr.f32.gmra.mxu1 %v1229_v26  ;;  %2963 = vmatpush3.msra.mxu0 %v2600_v45 }
 0x1c8   : > { %2893 = vmatprep.mubr.f32.mxu1 %v1230_v57 }
 0x1cb   : > { %2894 = vmatmul.mubr.f32.gmra.mxu1 %v1231_v61 }
 0x1cc   : > { %2896 = vmatprep.mubr.f32.mxu1 %v1232_v63 }
 0x1cf   : > { %2897 = vmatmul.mubr.f32.gmra.mxu1 %v1233_v54 }
 0x1d0   : > { %v2824_v8 = vpop.f32.mrf.mxu0  ;;  %2899 = vmatprep.mubr.f32.mxu1 %v1234_v2 }
 0x1d1   : > { %v1131_v53 = vadd.f32 %v2824_v8, %v3638_v34 }
 0x1d2   : > { %v1125_v7 = vpop.f32.mrf.mxu0 }
 0x1d3   : > { %v1126_v1 = vadd.f32 %v3638_v34, %v1125_v7  ;;  %2900 = vmatmul.mubr.f32.gmra.mxu1 %v1235_v4  ;;  %v1237_v9 = vmax.f32 %v1131_v53, 0.0 }
 0x1d5   : > { %v1236_v17 = vmax.f32 %v1126_v1, 0.0 }
 0x1d7   : > { %2902 = vmatprep.mubr.f32.mxu1 %v1236_v17 }
 0x1d8   : > { %2903 = vmatmul.mubr.f32.gmra.mxu1 %v1237_v9 }
 0x1e3   : > { %v2827_v31 = vpop.f32.mrf.mxu0 }
 0x1e4   : > { %v1141_v21 = vadd.f32 %v2827_v31, %v3638_v34 }
 0x1e5   : > { %v1135_v12 = vpop.f32.mrf.mxu0 }
 0x1e6   : > { %v1136_v13 = vadd.f32 %v3638_v34, %v1135_v12  ;;  %v1239_v27 = vmax.f32 %v1141_v21, 0.0 }
 0x1e8   : > { %v1238_v14 = vmax.f32 %v1136_v13, 0.0 }
 0x1ea   : > { %2905 = vmatprep.mubr.f32.mxu1 %v1238_v14  ;;  %v3725_v14 = vld [vmem:[%s4340_s4 + $0x1] ss:$0 sm:$0xff] }
 0x1eb   : > { %2906 = vmatmul.mubr.f32.gmra.mxu1 %v1239_v27 }
 0x1f6   : > { %v2830_v38 = vpop.f32.mrf.mxu1 }
 0x1f7   : > { %v1151_v28 = vadd.f32 %v2830_v38, %v3638_v34 }
 0x1f8   : > { %v1145_v35 = vpop.f32.mrf.mxu1 }
 0x1f9   : > { %v1146_v58 = vadd.f32 %v3638_v34, %v1145_v35  ;;  %v1241_v40 = vmax.f32 %v1151_v28, 0.0 }
 0x1fb   : > { %v1240_v23 = vmax.f32 %v1146_v58, 0.0 }
 0x1fd   : > { %2908 = vmatprep.mubr.f32.mxu1 %v1240_v23 }
 0x1fe   : > { %2909 = vmatmul.mubr.f32.gmra.mxu1 %v1241_v40 }
 0x209   : > { %v2833_v44 = vpop.f32.mrf.mxu1 }
 0x20a   : > { %v1161_v30 = vadd.f32 %v2833_v44, %v3638_v34 }
 0x20b   : > { %v1155_v46 = vpop.f32.mrf.mxu1 }
 0x20c   : > { %v1156_v29 = vadd.f32 %v3638_v34, %v1155_v46  ;;  %v1243_v49 = vmax.f32 %v1161_v30, 0.0 }
 0x20e   : > { %v1242_v51 = vmax.f32 %v1156_v29, 0.0 }
 0x210   : > { %2911 = vmatprep.mubr.f32.mxu1 %v1242_v51 }
 0x211   : > { %2912 = vmatmul.mubr.f32.gmra.mxu1 %v1243_v49 }
 0x21c   : > { %v2836_v19 = vpop.f32.mrf.mxu1 }
 0x21d   : > { %v1171_v50 = vadd.f32 %v2836_v19, %v3638_v34 }
 0x21e   : > { %v1165_v52 = vpop.f32.mrf.mxu1 }
 0x21f   : > { %v1166_v48 = vadd.f32 %v3638_v34, %v1165_v52  ;;  %v1245_v55 = vmax.f32 %v1171_v50, 0.0 }
 0x221   : > { %v1244_v56 = vmax.f32 %v1166_v48, 0.0 }
 0x223   : > { %2914 = vmatprep.mubr.f32.mxu1 %v1244_v56 }
 0x224   : > { %2915 = vmatmul.mubr.f32.gmra.mxu1 %v1245_v55 }
 0x22f   : > { %v2839_v24 = vpop.f32.mrf.mxu1 }
 0x230   : > { %v1181_v62 = vadd.f32 %v2839_v24, %v3638_v34 }
 0x231   : > { %v1175_v0 = vpop.f32.mrf.mxu1 }
 0x232   : > { %v1176_v42 = vadd.f32 %v3638_v34, %v1175_v0  ;;  %v1247_v11 = vmax.f32 %v1181_v62, 0.0 }
 0x234   : > { %v1246_v26 = vmax.f32 %v1176_v42, 0.0 }
 0x236   : > { %2917 = vmatprep.mubr.f32.mxu1 %v1246_v26 }
 0x237   : > { %2918 = vmatmul.mubr.f32.gmra.mxu1 %v1247_v11 }
 0x242   : > { %v2842_v57 = vpop.f32.mrf.mxu1 }
 0x243   : > { %v1191_v59 = vadd.f32 %v2842_v57, %v3638_v34 }
 0x244   : > { %v1185_v60 = vpop.f32.mrf.mxu1 }
 0x245   : > { %v1186_v61 = vadd.f32 %v3638_v34, %v1185_v60  ;;  %v1249_v63 = vmax.f32 %v1191_v59, 0.0 }
 0x247   : > { %v1248_v3 = vmax.f32 %v1186_v61, 0.0 }
 0x249   : > { %2920 = vmatprep.mubr.f32.mxu1 %v1248_v3 }
 0x24a   : > { %2921 = vmatmul.mubr.f32.gmra.mxu1 %v1249_v63 }
 0x255   : > { %v2845_v33 = vpop.f32.mrf.mxu1 }
 0x256   : > { %v1201_v54 = vadd.f32 %v2845_v33, %v3638_v34 }
 0x257   : > { %v1195_v5 = vpop.f32.mrf.mxu1 }
 0x258   : > { %v1196_v2 = vadd.f32 %v3638_v34, %v1195_v5  ;;  %v1251_v4 = vmax.f32 %v1201_v54, 0.0 }
 0x25a   : > { %v1250_v8 = vmax.f32 %v1196_v2, 0.0 }
 0x25c   : > { %2923 = vmatprep.mubr.f32.mxu1 %v1250_v8 }
 0x25d   : > { %2924 = vmatmul.mubr.f32.gmra.mxu1 %v1251_v4 }
 0x268   : > { %v2848_v53 = vpop.f32.mrf.mxu1 }
 0x269   : > { %v1211_v7 = vadd.f32 %v2848_v53, %v3638_v34 }
 0x26a   : > { %v1205_v1 = vpop.f32.mrf.mxu1 }
 0x26b   : > { %v1206_v17 = vadd.f32 %v3638_v34, %v1205_v1  ;;  %v1253_v16 = vmax.f32 %v1211_v7, 0.0 }
 0x26d   : > { %v1252_v9 = vmax.f32 %v1206_v17, 0.0 }
 0x26f   : > { %2926 = vmatprep.mubr.f32.mxu1 %v1252_v9 }
 0x270   : > { %2927 = vmatmul.mubr.f32.gmra.mxu1 %v1253_v16 }
 0x27b   : > { %v2851_v31 = vpop.f32.mrf.mxu1 }
 0x27c   : > { %v1221_v21 = vadd.f32 %v2851_v31, %v3638_v34 }
 0x27d   : > { %v1215_v12 = vpop.f32.mrf.mxu1 }
 0x27e   : > { %v1216_v13 = vadd.f32 %v3638_v34, %v1215_v12  ;;  %v1255_v25 = vmax.f32 %v1221_v21, 0.0 }
 0x27f   : > { %v2886_v22 = vpop.f32.mrf.mxu1 }
 0x280   : > { %v1254_v27 = vmax.f32 %v1216_v13, 0.0  ;;  %v1353_v32 = vadd.f32 %v2886_v22, %v3725_v14 }
 0x281   : > { %v1347_v15 = vpop.f32.mrf.mxu1 }
 0x282   : > { %v1348_v20 = vadd.f32 %v3725_v14, %v1347_v15  ;;  %2929 = vmatprep.mubr.f32.mxu1 %v1254_v27  ;;  %v1507_v37 = vmax.f32 %v1353_v32, 0.0 }
 0x283   : > { %v2889_v18 = vpop.f32.mrf.mxu1  ;;  %2930 = vmatmul.mubr.f32.gmra.mxu1 %v1255_v25 }
 0x284   : > { %v1506_v36 = vmax.f32 %v1348_v20, 0.0  ;;  %v1363_v34 = vadd.f32 %v2889_v18, %v3725_v14 }
 0x285   : > { %v1357_v38 = vpop.f32.mrf.mxu1 }
 0x286   : > { %v1358_v10 = vadd.f32 %v3725_v14, %v1357_v38  ;;  %2964 = vmatprep.mubr.f32.mxu0 %v1506_v36  ;;  %v1509_v39 = vmax.f32 %v1363_v34, 0.0 }
 0x287   : > { %v2892_v28 = vpop.f32.mrf.mxu1  ;;  %2965 = vmatmul.mubr.f32.vlgmr.msra.gmra.mxu0 %v1507_v37 }
 0x288   : > { %v1508_v35 = vmax.f32 %v1358_v10, 0.0  ;;  %v1373_v58 = vadd.f32 %v2892_v28, %v3725_v14 }
 0x289   : > { %v1367_v23 = vpop.f32.mrf.mxu1 }
 0x28a   : > { %v1368_v40 = vadd.f32 %v3725_v14, %v1367_v23  ;;  %2967 = vmatprep.mubr.f32.mxu0 %v1508_v35  ;;  %v1511_v6 = vmax.f32 %v1373_v58, 0.0 }
 0x28b   : > { %v2895_v41 = vpop.f32.mrf.mxu1  ;;  %2968 = vmatmul.mubr.f32.gmra.mxu0 %v1509_v39 }
 0x28c   : > { %v1510_v47 = vmax.f32 %v1368_v40, 0.0  ;;  %v1383_v43 = vadd.f32 %v2895_v41, %v3725_v14 }
 0x28d   : > { %v1377_v45 = vpop.f32.mrf.mxu1 }
 0x28e   : > { %v1378_v44 = vadd.f32 %v3725_v14, %v1377_v45  ;;  %2970 = vmatprep.mubr.f32.mxu0 %v1510_v47  ;;  %v1513_v29 = vmax.f32 %v1383_v43, 0.0 }
 0x28f   : > { %v2898_v30 = vpop.f32.mrf.mxu1  ;;  %2971 = vmatmul.mubr.f32.gmra.mxu0 %v1511_v6 }
 0x290   : > { %v1512_v46 = vmax.f32 %v1378_v44, 0.0  ;;  %v1393_v51 = vadd.f32 %v2898_v30, %v3725_v14 }
 0x291   : > { %v1387_v49 = vpop.f32.mrf.mxu1 }
 0x292   : > { %v1388_v19 = vadd.f32 %v3725_v14, %v1387_v49  ;;  %2973 = vmatprep.mubr.f32.mxu0 %v1512_v46  ;;  %v1515_v48 = vmax.f32 %v1393_v51, 0.0 }
 0x293   : > { %v2901_v50 = vpop.f32.mrf.mxu1  ;;  %2974 = vmatmul.mubr.f32.gmra.mxu0 %v1513_v29 }
 0x294   : > { %v1514_v52 = vmax.f32 %v1388_v19, 0.0  ;;  %v1403_v56 = vadd.f32 %v2901_v50, %v3725_v14 }
 0x295   : > { %v1397_v55 = vpop.f32.mrf.mxu1 }
 0x296   : > { %v1398_v24 = vadd.f32 %v3725_v14, %v1397_v55  ;;  %2976 = vmatprep.mubr.f32.mxu0 %v1514_v52  ;;  %v1517_v42 = vmax.f32 %v1403_v56, 0.0 }
 0x297   : > { %2977 = vmatmul.mubr.f32.gmra.mxu0 %v1515_v48  ;;  %v3761_v48 = vld [vmem:[%s4340_s4 + $0x2] ss:$0 sm:$0xff] }
 0x298   : > { %v1516_v62 = vmax.f32 %v1398_v24, 0.0  ;;  %v2904_v0 = vpop.f32.mrf.mxu1 }
 0x299   : > { %v1413_v26 = vadd.f32 %v2904_v0, %v3725_v14 }
 0x29a   : > { %v1407_v11 = vpop.f32.mrf.mxu1  ;;  %2979 = vmatprep.mubr.f32.mxu0 %v1516_v62 }
 0x29b   : > { %v1408_v57 = vadd.f32 %v3725_v14, %v1407_v11  ;;  %2980 = vmatmul.mubr.f32.gmra.mxu0 %v1517_v42  ;;  %v1519_v60 = vmax.f32 %v1413_v26, 0.0  ;;  %v3768_v26 = vld [vmem:[%s4341_s5] ss:$0 sm:$0xff] }
 0x29d   : > { %v1518_v59 = vmax.f32 %v1408_v57, 0.0 }
 0x29f   : > { %2982 = vmatprep.mubr.f32.mxu0 %v1518_v59 }
 0x2a0   : > { %2983 = vmatmul.mubr.f32.gmra.mxu0 %v1519_v60 }
 0x2ab   : > { %v2907_v61 = vpop.f32.mrf.mxu1 }
 0x2ac   : > { %v1423_v3 = vadd.f32 %v2907_v61, %v3725_v14 }
 0x2ad   : > { %v1417_v63 = vpop.f32.mrf.mxu1 }
 0x2ae   : > { %v1418_v33 = vadd.f32 %v3725_v14, %v1417_v63  ;;  %v1521_v5 = vmax.f32 %v1423_v3, 0.0 }
 0x2b0   : > { %v1520_v54 = vmax.f32 %v1418_v33, 0.0  ;;  %v3782_v33 = vld [vmem:[%s4341_s5 + $0x2] ss:$0 sm:$0xff] }
 0x2b2   : > { %2985 = vmatprep.mubr.f32.mxu0 %v1520_v54 }
 0x2b3   : > { %2986 = vmatmul.mubr.f32.gmra.mxu0 %v1521_v5 }
 0x2be   : > { %v2910_v2 = vpop.f32.mrf.mxu1 }
 0x2bf   : > { %v1433_v8 = vadd.f32 %v2910_v2, %v3725_v14 }
 0x2c0   : > { %v1427_v4 = vpop.f32.mrf.mxu1 }
 0x2c1   : > { %v1428_v53 = vadd.f32 %v3725_v14, %v1427_v4  ;;  %v1523_v1 = vmax.f32 %v1433_v8, 0.0  ;;  %v3790_v4 = vld [vmem:[%s4341_s5 + $0x3] ss:$0 sm:$0xff] }
 0x2c3   : > { %v1522_v7 = vmax.f32 %v1428_v53, 0.0 }
 0x2c5   : > { %2988 = vmatprep.mubr.f32.mxu0 %v1522_v7 }
 0x2c6   : > { %2989 = vmatmul.mubr.f32.gmra.mxu0 %v1523_v1 }
 0x2d1   : > { %v2913_v17 = vpop.f32.mrf.mxu1 }
 0x2d2   : > { %v1443_v9 = vadd.f32 %v2913_v17, %v3725_v14 }
 0x2d3   : > { %v1437_v16 = vpop.f32.mrf.mxu1 }
 0x2d4   : > { %v1438_v31 = vadd.f32 %v3725_v14, %v1437_v16  ;;  %v1525_v12 = vmax.f32 %v1443_v9, 0.0 }
 0x2d6   : > { %v1524_v21 = vmax.f32 %v1438_v31, 0.0 }
 0x2d8   : > { %2991 = vmatprep.mubr.f32.mxu0 %v1524_v21 }
 0x2d9   : > { %2992 = vmatmul.mubr.f32.gmra.mxu0 %v1525_v12 }
 0x2e4   : > { %v2916_v13 = vpop.f32.mrf.mxu1 }
 0x2e5   : > { %v1453_v22 = vadd.f32 %v2916_v13, %v3725_v14 }
 0x2e6   : > { %v1447_v27 = vpop.f32.mrf.mxu1 }
 0x2e7   : > { %v1448_v25 = vadd.f32 %v3725_v14, %v1447_v27  ;;  %v1527_v15 = vmax.f32 %v1453_v22, 0.0 }
 0x2e9   : > { %v1526_v32 = vmax.f32 %v1448_v25, 0.0 }
 0x2eb   : > { %2994 = vmatprep.mubr.f32.mxu0 %v1526_v32 }
 0x2ec   : > { %2995 = vmatmul.mubr.f32.gmra.mxu0 %v1527_v15 }
 0x2f7   : > { %v2919_v20 = vpop.f32.mrf.mxu1 }
 0x2f8   : > { %v1463_v18 = vadd.f32 %v2919_v20, %v3725_v14 }
 0x2f9   : > { %v1457_v36 = vpop.f32.mrf.mxu1 }
 0x2fa   : > { %v1458_v37 = vadd.f32 %v3725_v14, %v1457_v36  ;;  %v1529_v38 = vmax.f32 %v1463_v18, 0.0 }
 0x2fc   : > { %v1528_v34 = vmax.f32 %v1458_v37, 0.0 }
 0x2fe   : > { %2997 = vmatprep.mubr.f32.mxu0 %v1528_v34 }
 0x2ff   : > { %2998 = vmatmul.mubr.f32.gmra.mxu0 %v1529_v38 }
 0x30a   : > { %v2922_v10 = vpop.f32.mrf.mxu1 }
 0x30b   : > { %v1473_v28 = vadd.f32 %v2922_v10, %v3725_v14 }
 0x30c   : > { %v1467_v35 = vpop.f32.mrf.mxu1 }
 0x30d   : > { %v1468_v39 = vadd.f32 %v3725_v14, %v1467_v35  ;;  %v1531_v23 = vmax.f32 %v1473_v28, 0.0 }
 0x30f   : > { %v1530_v58 = vmax.f32 %v1468_v39, 0.0 }
 0x311   : > { %3000 = vmatprep.mubr.f32.mxu0 %v1530_v58 }
 0x312   : > { %3001 = vmatmul.mubr.f32.gmra.mxu0 %v1531_v23 }
 0x31d   : > { %v2925_v40 = vpop.f32.mrf.mxu1 }
 0x31e   : > { %v1483_v41 = vadd.f32 %v2925_v40, %v3725_v14 }
 0x31f   : > { %v1477_v47 = vpop.f32.mrf.mxu1 }
 0x320   : > { %v1478_v6 = vadd.f32 %v3725_v14, %v1477_v47  ;;  %v1533_v45 = vmax.f32 %v1483_v41, 0.0 }
 0x322   : > { %v1532_v43 = vmax.f32 %v1478_v6, 0.0 }
 0x324   : > { %3003 = vmatprep.mubr.f32.mxu0 %v1532_v43 }
 0x325   : > { %3004 = vmatmul.mubr.f32.gmra.mxu0 %v1533_v45 }
 0x330   : > { %v2928_v44 = vpop.f32.mrf.mxu1 }
 0x331   : > { %v1493_v30 = vadd.f32 %v2928_v44, %v3725_v14 }
 0x332   : > { %v1487_v46 = vpop.f32.mrf.mxu1 }
 0x333   : > { %v1488_v29 = vadd.f32 %v3725_v14, %v1487_v46  ;;  %v1535_v49 = vmax.f32 %v1493_v30, 0.0 }
 0x335   : > { %v1534_v51 = vmax.f32 %v1488_v29, 0.0 }
 0x337   : > { %3006 = vmatprep.mubr.f32.mxu0 %v1534_v51 }
 0x338   : > { %3007 = vmatmul.mubr.f32.gmra.mxu0 %v1535_v49 }
 0x343   : > { %v2931_v19 = vpop.f32.mrf.mxu1 }
 0x344   : > { %v1503_v50 = vadd.f32 %v2931_v19, %v3725_v14 }
 0x345   : > { %v1497_v52 = vpop.f32.mrf.mxu1 }
 0x346   : > { %v1498_v56 = vadd.f32 %v3725_v14, %v1497_v52  ;;  %v1537_v0 = vmax.f32 %v1503_v50, 0.0  ;;  %v3775_v14 = vld [vmem:[%s4341_s5 + $0x1] ss:$0 sm:$0xff] }
 0x347   : > { %v2966_v55 = vpop.f32.mrf.mxu0 }
 0x348   : > { %v1536_v24 = vmax.f32 %v1498_v56, 0.0  ;;  %v1635_v62 = vadd.f32 %v2966_v55, %v3761_v48 }
 0x349   : > { %v1629_v42 = vpop.f32.mrf.mxu0 }
 0x34a   : > { %v1789_v11 = vmax.f32 %v1635_v62, 0.0  ;;  %v1630_v57 = vadd.f32 %v3761_v48, %v1629_v42  ;;  %3009 = vmatprep.mubr.f32.mxu0 %v1536_v24 }
 0x34b   : > { %3010 = vmatmul.mubr.f32.gmra.mxu0 %v1537_v0  ;;  %v2969_v3 = vpop.f32.mrf.mxu0 }
 0x34c   : > { %v1788_v59 = vmax.f32 %v1630_v57, 0.0  ;;  %v1826_v60 = vmul.f32 %v3768_v26, %v1789_v11  ;;  %v1999_v63 = vmul.f32 %v3775_v14, %v1789_v11  ;;  %v1645_v2 = vadd.f32 %v2969_v3, %v3761_v48 }
 0x34d   : > { %v1639_v5 = vpop.f32.mrf.mxu0  ;;  %v2172_v8 = vmul.f32 %v3782_v33, %v1789_v11  ;;  %v2345_v17 = vmul.f32 %v3790_v4, %v1789_v11 }
 0x34e   : > { %1859 = vadd.xlane.f32.xlu0 %v1826_v60  ;;  %v1825_v61 = vmul.f32 %v3768_v26, %v1788_v59  ;;  %v1998_v54 = vmul.f32 %v3775_v14, %v1788_v59  ;;  %v1640_v53 = vadd.f32 %v3761_v48, %v1639_v5  ;;  %v2171_v7 = vmul.f32 %v3782_v33, %v1788_v59 }
 0x34f   : > { %v1791_v1 = vmax.f32 %v1645_v2, 0.0  ;;  %v2344_v16 = vmul.f32 %v3790_v4, %v1788_v59  ;;  %v2972_v12 = vpop.f32.mrf.mxu0 }
 0x350   : > { %1857 = vadd.xlane.f32.xlu1 %v1825_v61  ;;  %v1790_v9 = vmax.f32 %v1640_v53, 0.0  ;;  %v1655_v25 = vadd.f32 %v2972_v12, %v3761_v48 }
 0x351   : > { %v1828_v31 = vmul.f32 %v3768_v26, %v1791_v1  ;;  %v2001_v13 = vmul.f32 %v3775_v14, %v1791_v1  ;;  %v1649_v27 = vpop.f32.mrf.mxu0  ;;  %v2174_v32 = vmul.f32 %v3782_v33, %v1791_v1  ;;  %v2347_v36 = vmul.f32 %v3790_v4, %v1791_v1 }
 0x352   : > { %2032 = vadd.xlane.f32.xlu0 %v1999_v63  ;;  %v1827_v21 = vmul.f32 %v3768_v26, %v1790_v9  ;;  %v2000_v22 = vmul.f32 %v3775_v14, %v1790_v9  ;;  %v1650_v15 = vadd.f32 %v3761_v48, %v1649_v27  ;;  %v2173_v20 = vmul.f32 %v3782_v33, %v1790_v9 }
 0x353   : > { %v1793_v18 = vmax.f32 %v1655_v25, 0.0  ;;  %v2346_v34 = vmul.f32 %v3790_v4, %v1790_v9  ;;  %v2975_v28 = vpop.f32.mrf.mxu0 }
 0x354   : > { %2030 = vadd.xlane.f32.xlu1 %v1998_v54  ;;  %v1792_v37 = vmax.f32 %v1650_v15, 0.0  ;;  %v1665_v23 = vadd.f32 %v2975_v28, %v3761_v48 }
 0x355   : > { %v1830_v38 = vmul.f32 %v3768_v26, %v1793_v18  ;;  %v2003_v35 = vmul.f32 %v3775_v14, %v1793_v18  ;;  %v1659_v58 = vpop.f32.mrf.mxu0  ;;  %v2176_v40 = vmul.f32 %v3782_v33, %v1793_v18  ;;  %v2349_v43 = vmul.f32 %v3790_v4, %v1793_v18 }
 0x356   : > { %2205 = vadd.xlane.f32.xlu0 %v2172_v8  ;;  %v1829_v10 = vmul.f32 %v3768_v26, %v1792_v37  ;;  %v2002_v39 = vmul.f32 %v3775_v14, %v1792_v37  ;;  %v1660_v41 = vadd.f32 %v3761_v48, %v1659_v58  ;;  %v2175_v47 = vmul.f32 %v3782_v33, %v1792_v37 }
 0x357   : > { %v1795_v6 = vmax.f32 %v1665_v23, 0.0  ;;  %v2348_v44 = vmul.f32 %v3790_v4, %v1792_v37  ;;  %v2978_v29 = vpop.f32.mrf.mxu0 }
 0x358   : > { %2203 = vadd.xlane.f32.xlu1 %v2171_v7  ;;  %v1794_v45 = vmax.f32 %v1660_v41, 0.0  ;;  %v1675_v50 = vadd.f32 %v2978_v29, %v3761_v48 }
 0x359   : > { %v1832_v30 = vmul.f32 %v3768_v26, %v1795_v6  ;;  %v2005_v51 = vmul.f32 %v3775_v14, %v1795_v6  ;;  %v1669_v19 = vpop.f32.mrf.mxu0  ;;  %v2178_v52 = vmul.f32 %v3782_v33, %v1795_v6  ;;  %v2351_v62 = vmul.f32 %v3790_v4, %v1795_v6 }
 0x35a   : > { %2378 = vadd.xlane.f32.xlu0 %v2345_v17  ;;  %v1831_v46 = vmul.f32 %v3768_v26, %v1794_v45  ;;  %v2004_v49 = vmul.f32 %v3775_v14, %v1794_v45  ;;  %v1670_v56 = vadd.f32 %v3761_v48, %v1669_v19  ;;  %v2177_v55 = vmul.f32 %v3782_v33, %v1794_v45 }
 0x35b   : > { %v1797_v24 = vmax.f32 %v1675_v50, 0.0  ;;  %v2350_v42 = vmul.f32 %v3790_v4, %v1794_v45  ;;  %v2981_v59 = vpop.f32.mrf.mxu0 }
 0x35c   : > { %2376 = vadd.xlane.f32.xlu1 %v2344_v16  ;;  %v1796_v0 = vmax.f32 %v1670_v56, 0.0  ;;  %v1685_v63 = vadd.f32 %v2981_v59, %v3761_v48 }
 0x35d   : > { %v1834_v11 = vmul.f32 %v3768_v26, %v1797_v24  ;;  %v2007_v60 = vmul.f32 %v3775_v14, %v1797_v24  ;;  %v1679_v3 = vpop.f32.mrf.mxu0  ;;  %v2180_v54 = vmul.f32 %v3782_v33, %v1797_v24  ;;  %v2353_v53 = vmul.f32 %v3790_v4, %v1797_v24 }
 0x35e   : > { %1863 = vadd.xlane.f32.xlu0 %v1828_v31  ;;  %v1833_v57 = vmul.f32 %v3768_v26, %v1796_v0  ;;  %v2006_v61 = vmul.f32 %v3775_v14, %v1796_v0  ;;  %v1680_v5 = vadd.f32 %v3761_v48, %v1679_v3  ;;  %v2179_v2 = vmul.f32 %v3782_v33, %v1796_v0  ;;  %v3875_v3 = vld [vmem:[%s4342_s6] ss:$0 sm:$0xff] }
 0x35f   : > { %v1799_v8 = vmax.f32 %v1685_v63, 0.0  ;;  %v2352_v1 = vmul.f32 %v3790_v4, %v1796_v0 }
 0x360   : > { %1861 = vadd.xlane.f32.xlu1 %v1827_v21  ;;  %v1798_v7 = vmax.f32 %v1680_v5, 0.0  ;;  %v2984_v16 = vpop.f32.mrf.mxu0 }
 0x361   : > { %v1836_v17 = vmul.f32 %v3768_v26, %v1799_v8  ;;  %v2009_v31 = vmul.f32 %v3775_v14, %v1799_v8  ;;  %v2355_v15 = vmul.f32 %v3790_v4, %v1799_v8 }
 0x362   : > { %2036 = vadd.xlane.f32.xlu0 %v2001_v13  ;;  %v1835_v9 = vmul.f32 %v3768_v26, %v1798_v7  ;;  %v2008_v21 = vmul.f32 %v3775_v14, %v1798_v7  ;;  %v1689_v12 = vpop.f32.mrf.mxu0  ;;  %v1695_v13 = vadd.f32 %v2984_v16, %v3761_v48  ;;  %v2181_v25 = vmul.f32 %v3782_v33, %v1798_v7 }
 0x363   : > { %v1690_v27 = vadd.f32 %v3761_v48, %v1689_v12  ;;  %v2354_v18 = vmul.f32 %v3790_v4, %v1798_v7 }
 0x364   : > { %2034 = vadd.xlane.f32.xlu1 %v2000_v22  ;;  %v2182_v22 = vmul.f32 %v3782_v33, %v1799_v8 }
 0x366   : > { %2209 = vadd.xlane.f32.xlu0 %v2174_v32  ;;  %v1801_v32 = vmax.f32 %v1695_v13, 0.0 }
 0x368   : > { %2207 = vadd.xlane.f32.xlu1 %v2173_v20  ;;  %v1800_v20 = vmax.f32 %v1690_v27, 0.0  ;;  %v2357_v41 = vmul.f32 %v3790_v4, %v1801_v32 }
 0x36a   : > { %2382 = vadd.xlane.f32.xlu0 %v2347_v36  ;;  %v1838_v36 = vmul.f32 %v3768_v26, %v1801_v32  ;;  %v1837_v37 = vmul.f32 %v3768_v26, %v1800_v20  ;;  %v2183_v23 = vmul.f32 %v3782_v33, %v1800_v20  ;;  %v2356_v6 = vmul.f32 %v3790_v4, %v1800_v20 }
 0x36c   : > { %2380 = vadd.xlane.f32.xlu1 %v2346_v34 }
 0x36e   : > { %1867 = vadd.xlane.f32.xlu0 %v1830_v38  ;;  %v2011_v38 = vmul.f32 %v3775_v14, %v1801_v32 }
 0x370   : > { %1865 = vadd.xlane.f32.xlu1 %v1829_v10  ;;  %v2010_v10 = vmul.f32 %v3775_v14, %v1800_v20 }
 0x372   : > { %2040 = vadd.xlane.f32.xlu0 %v2003_v35 }
 0x373   : > { %v2987_v34 = vpop.f32.mrf.mxu0 }
 0x374   : > { %2038 = vadd.xlane.f32.xlu1 %v2002_v39  ;;  %v1705_v35 = vadd.f32 %v2987_v34, %v3761_v48  ;;  %v2184_v39 = vmul.f32 %v3782_v33, %v1801_v32 }
 0x375   : > { %v1699_v28 = vpop.f32.mrf.mxu0 }
 0x376   : > { %2213 = vadd.xlane.f32.xlu0 %v2176_v40  ;;  %v1700_v58 = vadd.f32 %v3761_v48, %v1699_v28  ;;  %v1803_v40 = vmax.f32 %v1705_v35, 0.0 }
 0x378   : > { %2211 = vadd.xlane.f32.xlu1 %v2175_v47  ;;  %v1802_v47 = vmax.f32 %v1700_v58, 0.0  ;;  %v2359_v56 = vmul.f32 %v3790_v4, %v1803_v40 }
 0x37a   : > { %2386 = vadd.xlane.f32.xlu0 %v2349_v43  ;;  %v1840_v43 = vmul.f32 %v3768_v26, %v1803_v40  ;;  %v1839_v45 = vmul.f32 %v3768_v26, %v1802_v47  ;;  %v2185_v50 = vmul.f32 %v3782_v33, %v1802_v47  ;;  %v2358_v24 = vmul.f32 %v3790_v4, %v1802_v47 }
 0x37c   : > { %2384 = vadd.xlane.f32.xlu1 %v2348_v44 }
 0x37e   : > { %1871 = vadd.xlane.f32.xlu0 %v1832_v30  ;;  %v2013_v30 = vmul.f32 %v3775_v14, %v1803_v40 }
 0x380   : > { %1869 = vadd.xlane.f32.xlu1 %v1831_v46  ;;  %v2012_v46 = vmul.f32 %v3775_v14, %v1802_v47 }
 0x382   : > { %2044 = vadd.xlane.f32.xlu0 %v2005_v51 }
 0x384   : > { %2042 = vadd.xlane.f32.xlu1 %v2004_v49  ;;  %v2186_v49 = vmul.f32 %v3782_v33, %v1803_v40 }
 0x386   : > { %2217 = vadd.xlane.f32.xlu0 %v2178_v52  ;;  %v2990_v44 = vpop.f32.mrf.mxu0 }
 0x387   : > { %v1715_v51 = vadd.f32 %v2990_v44, %v3761_v48 }
 0x388   : > { %2215 = vadd.xlane.f32.xlu1 %v2177_v55  ;;  %v1709_v29 = vpop.f32.mrf.mxu0 }
 0x389   : > { %v1710_v19 = vadd.f32 %v3761_v48, %v1709_v29  ;;  %v1805_v52 = vmax.f32 %v1715_v51, 0.0 }
 0x38a   : > { %2390 = vadd.xlane.f32.xlu0 %v2351_v62 }
 0x38b   : > { %v1804_v55 = vmax.f32 %v1710_v19, 0.0  ;;  %v1842_v62 = vmul.f32 %v3768_v26, %v1805_v52 }
 0x38c   : > { %2388 = vadd.xlane.f32.xlu1 %v2350_v42 }
 0x38d   : > { %v1841_v0 = vmul.f32 %v3768_v26, %v1804_v55 }
 0x38e   : > { %1875 = vadd.xlane.f32.xlu0 %v1834_v11  ;;  %v2015_v11 = vmul.f32 %v3775_v14, %v1805_v52 }
 0x390   : > { %1873 = vadd.xlane.f32.xlu1 %v1833_v57  ;;  %v2014_v57 = vmul.f32 %v3775_v14, %v1804_v55 }
 0x392   : > { %2048 = vadd.xlane.f32.xlu0 %v2007_v60 }
 0x394   : > { %2046 = vadd.xlane.f32.xlu1 %v2006_v61  ;;  %v2188_v61 = vmul.f32 %v3782_v33, %v1805_v52 }
 0x396   : > { %2221 = vadd.xlane.f32.xlu0 %v2180_v54  ;;  %v2187_v54 = vmul.f32 %v3782_v33, %v1804_v55 }
 0x398   : > { %2219 = vadd.xlane.f32.xlu1 %v2179_v2 }
 0x399   : > { %v2993_v42 = vpop.f32.mrf.mxu0 }
 0x39a   : > { %2394 = vadd.xlane.f32.xlu0 %v2353_v53  ;;  %v1725_v60 = vadd.f32 %v2993_v42, %v3761_v48  ;;  %v2361_v53 = vmul.f32 %v3790_v4, %v1805_v52 }
 0x39b   : > { %v1719_v59 = vpop.f32.mrf.mxu0 }
 0x39c   : > { %2392 = vadd.xlane.f32.xlu1 %v2352_v1  ;;  %v1720_v63 = vadd.f32 %v3761_v48, %v1719_v59  ;;  %v1807_v2 = vmax.f32 %v1725_v60, 0.0 }
 0x39e   : > { %1879 = vadd.xlane.f32.xlu0 %v1836_v17  ;;  %v1806_v1 = vmax.f32 %v1720_v63, 0.0  ;;  %v2190_v28 = vmul.f32 %v3782_v33, %v1807_v2 }
 0x3a0   : > { %1877 = vadd.xlane.f32.xlu1 %v1835_v9  ;;  %v2360_v9 = vmul.f32 %v3790_v4, %v1804_v55 }
 0x3a2   : > { %2052 = vadd.xlane.f32.xlu0 %v2009_v31 }
 0x3a4   : > { %2050 = vadd.xlane.f32.xlu1 %v2008_v21  ;;  %v1844_v21 = vmul.f32 %v3768_v26, %v1807_v2 }
 0x3a6   : > { %2225 = vadd.xlane.f32.xlu0 %v2182_v22  ;;  %v1843_v22 = vmul.f32 %v3768_v26, %v1806_v1 }
 0x3a8   : > { %2223 = vadd.xlane.f32.xlu1 %v2181_v25 }
 0x3aa   : > { %2398 = vadd.xlane.f32.xlu0 %v2355_v15  ;;  %v2017_v15 = vmul.f32 %v3775_v14, %v1807_v2 }
 0x3ac   : > { %2396 = vadd.xlane.f32.xlu1 %v2354_v18  ;;  %v2996_v27 = vpop.f32.mrf.mxu0 }
 0x3ae   : > { %1883 = vadd.xlane.f32.xlu0 %v1838_v36  ;;  %v2016_v36 = vmul.f32 %v3775_v14, %v1806_v1 }
 0x3b0   : > { %1881 = vadd.xlane.f32.xlu1 %v1837_v37  ;;  %v1729_v37 = vpop.f32.mrf.mxu0 }
 0x3b2   : > { %2056 = vadd.xlane.f32.xlu0 %v2011_v38  ;;  %v1735_v38 = vadd.f32 %v2996_v27, %v3761_v48 }
 0x3b4   : > { %2054 = vadd.xlane.f32.xlu1 %v2010_v10 }
 0x3b6   : > { %2229 = vadd.xlane.f32.xlu0 %v2184_v39  ;;  %v1730_v39 = vadd.f32 %v3761_v48, %v1729_v37 }
 0x3b8   : > { %2227 = vadd.xlane.f32.xlu1 %v2183_v23  ;;  %v2189_v23 = vmul.f32 %v3782_v33, %v1806_v1 }
 0x3ba   : > { %2402 = vadd.xlane.f32.xlu0 %v2357_v41  ;;  %v1809_v41 = vmax.f32 %v1735_v38, 0.0 }
 0x3bc   : > { %2400 = vadd.xlane.f32.xlu1 %v2356_v6  ;;  %v2363_v6 = vmul.f32 %v3790_v4, %v1807_v2  ;;  %v1846_v51 = vmul.f32 %v3768_v26, %v1809_v41 }
 0x3be   : > { %1887 = vadd.xlane.f32.xlu0 %v1840_v43 }
 0x3bf   : > { %v2999_v52 = vpop.f32.mrf.mxu0 }
 0x3c0   : > { %1885 = vadd.xlane.f32.xlu1 %v1839_v45  ;;  %v1808_v45 = vmax.f32 %v1730_v39, 0.0  ;;  %v1745_v59 = vadd.f32 %v2999_v52, %v3761_v48 }
 0x3c2   : > { %2060 = vadd.xlane.f32.xlu0 %v2013_v30  ;;  %v2362_v30 = vmul.f32 %v3790_v4, %v1806_v1  ;;  %v2018_v42 = vmul.f32 %v3775_v14, %v1808_v45  ;;  %v2191_v2 = vmul.f32 %v3782_v33, %v1808_v45  ;;  %v2365_v1 = vmul.f32 %v3790_v4, %v1809_v41 }
 0x3c4   : > { %2058 = vadd.xlane.f32.xlu1 %v2012_v46 }
 0x3c6   : > { %2233 = vadd.xlane.f32.xlu0 %v2186_v49 }
 0x3c8   : > { %2231 = vadd.xlane.f32.xlu1 %v2185_v50  ;;  %v1845_v50 = vmul.f32 %v3768_v26, %v1808_v45 }
 0x3ca   : > { %2406 = vadd.xlane.f32.xlu0 %v2359_v56 }
 0x3cc   : > { %2404 = vadd.xlane.f32.xlu1 %v2358_v24  ;;  %v2019_v24 = vmul.f32 %v3775_v14, %v1809_v41 }
 0x3ce   : > { %1891 = vadd.xlane.f32.xlu0 %v1842_v62 }
 0x3d0   : > { %1889 = vadd.xlane.f32.xlu1 %v1841_v0 }
 0x3d2   : > { %2064 = vadd.xlane.f32.xlu0 %v2015_v11  ;;  %v1739_v11 = vpop.f32.mrf.mxu0 }
 0x3d4   : > { %2062 = vadd.xlane.f32.xlu1 %v2014_v57 }
 0x3d6   : > { %2237 = vadd.xlane.f32.xlu0 %v2188_v61  ;;  %v2192_v61 = vmul.f32 %v3782_v33, %v1809_v41 }
 0x3d7   : > { %v1860_v5 = vpop.xlane.xlu0 %1859 }
 0x3d8   : > { %v1929_v8 = vadd.f32 %v3875_v3, %v1860_v5  ;;  %2235 = vadd.xlane.f32.xlu1 %v2187_v54  ;;  %v1740_v54 = vadd.f32 %v3761_v48, %v1739_v11 }
 0x3d9   : > { %v1858_v7 = vpop.xlane.xlu1 %1857 }
 0x3da   : > { %1962 = vst.msk [vmem:[%s3884_s30 + $0x8] sm:$0xff] %vm1960_vm0, %v1929_v8  ;;  %v1928_v17 = vadd.f32 %v3875_v3, %v1858_v7  ;;  %2410 = vadd.xlane.f32.xlu0 %v2361_v53  ;;  %v1811_v53 = vmax.f32 %v1745_v59, 0.0 }
 0x3db   : > { %v2033_v16 = vpop.xlane.xlu0 %2032 }
 0x3dc   : > { %1961 = vst.msk [vmem:[%s3884_s30] sm:$0xff] %vm1960_vm0, %v1928_v17  ;;  %v2102_v31 = vadd.f32 %v3875_v3, %v2033_v16  ;;  %2408 = vadd.xlane.f32.xlu1 %v2360_v9  ;;  %v1810_v9 = vmax.f32 %v1740_v54, 0.0  ;;  %v2194_v39 = vmul.f32 %v3782_v33, %v1811_v53 }
 0x3dd   : > { %v2031_v12 = vpop.xlane.xlu1 %2030 }
 0x3de   : > { %2135 = vst.msk [vmem:[%s3884_s30 + $0x8] sm:$0xff] %vm2133_vm1, %v2102_v31  ;;  %v2101_v13 = vadd.f32 %v3875_v3, %v2031_v12  ;;  %1895 = vadd.xlane.f32.xlu0 %v1844_v21  ;;  %v2364_v31 = vmul.f32 %v3790_v4, %v1808_v45  ;;  %v2193_v41 = vmul.f32 %v3782_v33, %v1810_v9 }
 0x3df   : > { %v2206_v25 = vpop.xlane.xlu0 %2205  ;;  %v2367_v45 = vmul.f32 %v3790_v4, %v1811_v53 }
 0x3e0   : > { %2134 = vst.msk [vmem:[%s3884_s30] sm:$0xff] %vm2133_vm1, %v2101_v13  ;;  %v2275_v32 = vadd.f32 %v3875_v3, %v2206_v25  ;;  %1893 = vadd.xlane.f32.xlu1 %v1843_v22  ;;  %v1848_v13 = vmul.f32 %v3768_v26, %v1811_v53  ;;  %v1847_v25 = vmul.f32 %v3768_v26, %v1810_v9 }
 0x3e1   : > { %v2204_v20 = vpop.xlane.xlu1 %2203 }
 0x3e2   : > { %2308 = vst.msk [vmem:[%s3884_s30 + $0x8] sm:$0xff] %vm2306_vm2, %v2275_v32  ;;  %v2274_v18 = vadd.f32 %v3875_v3, %v2204_v20  ;;  %2068 = vadd.xlane.f32.xlu0 %v2017_v15  ;;  %v3002_v32 = vpop.f32.mrf.mxu0 }
 0x3e3   : > { %v2379_v34 = vpop.xlane.xlu0 %2378 }
 0x3e4   : > { %2307 = vst.msk [vmem:[%s3884_s30] sm:$0xff] %vm2306_vm2, %v2274_v18  ;;  %v2448_v10 = vadd.f32 %v3875_v3, %v2379_v34  ;;  %2066 = vadd.xlane.f32.xlu1 %v2016_v36  ;;  %v2021_v18 = vmul.f32 %v3775_v14, %v1811_v53  ;;  %v2020_v34 = vmul.f32 %v3775_v14, %v1810_v9  ;;  %v1749_v38 = vpop.f32.mrf.mxu0 }
 0x3e5   : > { %v2377_v35 = vpop.xlane.xlu1 %2376 }
 0x3e6   : > { %2481 = vst.msk [vmem:[%s3884_s30 + $0x8] sm:$0xff] %vm2479_vm3, %v2448_v10  ;;  %v2447_v58 = vadd.f32 %v3875_v3, %v2377_v35  ;;  %2241 = vadd.xlane.f32.xlu0 %v2190_v28  ;;  %v1755_v28 = vadd.f32 %v3002_v32, %v3761_v48 }
 0x3e7   : > { %v1864_v40 = vpop.xlane.xlu0 %1863 }
 0x3e8   : > { %2480 = vst.msk [vmem:[%s3884_s30] sm:$0xff] %vm2479_vm3, %v2447_v58  ;;  %v1931_v47 = vadd.f32 %v3875_v3, %v1864_v40  ;;  %2239 = vadd.xlane.f32.xlu1 %v2189_v23  ;;  %v1750_v23 = vadd.f32 %v3761_v48, %v1749_v38 }
 0x3e9   : > { %v1862_v43 = vpop.xlane.xlu1 %1861 }
 0x3ea   : > { %1964 = vst.msk [vmem:[%s3884_s30 + $0x18] sm:$0xff] %vm1960_vm0, %v1931_v47  ;;  %v1930_v44 = vadd.f32 %v3875_v3, %v1862_v43  ;;  %2414 = vadd.xlane.f32.xlu0 %v2363_v6  ;;  %v1813_v6 = vmax.f32 %v1755_v28, 0.0 }
 0x3eb   : > { %v2037_v46 = vpop.xlane.xlu0 %2036 }
 0x3ec   : > { %1963 = vst.msk [vmem:[%s3884_s30 + $0x10] sm:$0xff] %vm1960_vm0, %v1930_v44  ;;  %v2104_v29 = vadd.f32 %v3875_v3, %v2037_v46  ;;  %2412 = vadd.xlane.f32.xlu1 %v2362_v30  ;;  %v1812_v30 = vmax.f32 %v1750_v23, 0.0  ;;  %v2196_v54 = vmul.f32 %v3782_v33, %v1813_v6 }
 0x3ed   : > { %v2035_v49 = vpop.xlane.xlu1 %2034 }
 0x3ee   : > { %2137 = vst.msk [vmem:[%s3884_s30 + $0x18] sm:$0xff] %vm2133_vm1, %v2104_v29  ;;  %v2103_v19 = vadd.f32 %v3875_v3, %v2035_v49  ;;  %1899 = vadd.xlane.f32.xlu0 %v1846_v51  ;;  %v2366_v29 = vmul.f32 %v3790_v4, %v1810_v9  ;;  %v2195_v53 = vmul.f32 %v3782_v33, %v1812_v30 }
 0x3ef   : > { %v2210_v56 = vpop.xlane.xlu0 %2209  ;;  %v2369_v9 = vmul.f32 %v3790_v4, %v1813_v6 }
 0x3f0   : > { %2136 = vst.msk [vmem:[%s3884_s30 + $0x10] sm:$0xff] %vm2133_vm1, %v2103_v19  ;;  %v2277_v55 = vadd.f32 %v3875_v3, %v2210_v56  ;;  %1897 = vadd.xlane.f32.xlu1 %v1845_v50  ;;  %v1850_v19 = vmul.f32 %v3768_v26, %v1813_v6  ;;  %v1849_v56 = vmul.f32 %v3768_v26, %v1812_v30 }
 0x3f1   : > { %v2208_v62 = vpop.xlane.xlu1 %2207 }
 0x3f2   : > { %2310 = vst.msk [vmem:[%s3884_s30 + $0x18] sm:$0xff] %vm2306_vm2, %v2277_v55  ;;  %v2276_v0 = vadd.f32 %v3875_v3, %v2208_v62  ;;  %2072 = vadd.xlane.f32.xlu0 %v2019_v24  ;;  %v3005_v55 = vpop.f32.mrf.mxu0 }
 0x3f3   : > { %v2383_v57 = vpop.xlane.xlu0 %2382 }
 0x3f4   : > { %2309 = vst.msk [vmem:[%s3884_s30 + $0x10] sm:$0xff] %vm2306_vm2, %v2276_v0  ;;  %v2450_v60 = vadd.f32 %v3875_v3, %v2383_v57  ;;  %2070 = vadd.xlane.f32.xlu1 %v2018_v42  ;;  %v2023_v0 = vmul.f32 %v3775_v14, %v1813_v6  ;;  %v2022_v57 = vmul.f32 %v3775_v14, %v1812_v30  ;;  %v1759_v59 = vpop.f32.mrf.mxu0 }
 0x3f5   : > { %v2381_v63 = vpop.xlane.xlu1 %2380 }
 0x3f6   : > { %2483 = vst.msk [vmem:[%s3884_s30 + $0x18] sm:$0xff] %vm2479_vm3, %v2450_v60  ;;  %v2449_v5 = vadd.f32 %v3875_v3, %v2381_v63  ;;  %2245 = vadd.xlane.f32.xlu0 %v2192_v61  ;;  %v1765_v61 = vadd.f32 %v3005_v55, %v3761_v48 }
 0x3f7   : > { %v1868_v8 = vpop.xlane.xlu0 %1867 }
 0x3f8   : > { %2482 = vst.msk [vmem:[%s3884_s30 + $0x10] sm:$0xff] %vm2479_vm3, %v2449_v5  ;;  %v1933_v7 = vadd.f32 %v3875_v3, %v1868_v8  ;;  %2243 = vadd.xlane.f32.xlu1 %v2191_v2  ;;  %v1760_v2 = vadd.f32 %v3761_v48, %v1759_v59 }
 0x3f9   : > { %v1866_v17 = vpop.xlane.xlu1 %1865 }
 0x3fa   : > { %1966 = vst.msk [vmem:[%s3884_s30 + $0x28] sm:$0xff] %vm1960_vm0, %v1933_v7  ;;  %v1932_v16 = vadd.f32 %v3875_v3, %v1866_v17  ;;  %2418 = vadd.xlane.f32.xlu0 %v2365_v1  ;;  %v1815_v1 = vmax.f32 %v1765_v61, 0.0 }
 0x3fb   : > { %v2041_v21 = vpop.xlane.xlu0 %2040 }
 0x3fc   : > { %1965 = vst.msk [vmem:[%s3884_s30 + $0x20] sm:$0xff] %vm1960_vm0, %v1932_v16  ;;  %v2106_v12 = vadd.f32 %v3875_v3, %v2041_v21  ;;  %2416 = vadd.xlane.f32.xlu1 %v2364_v31  ;;  %v1814_v31 = vmax.f32 %v1760_v2, 0.0  ;;  %v2198_v23 = vmul.f32 %v3782_v33, %v1815_v1 }
 0x3fd   : > { %v2039_v22 = vpop.xlane.xlu1 %2038 }
 0x3fe   : > { %2139 = vst.msk [vmem:[%s3884_s30 + $0x28] sm:$0xff] %vm2133_vm1, %v2106_v12  ;;  %v2105_v27 = vadd.f32 %v3875_v3, %v2039_v22  ;;  %1903 = vadd.xlane.f32.xlu0 %v1848_v13  ;;  %v2368_v12 = vmul.f32 %v3790_v4, %v1812_v30  ;;  %v2197_v6 = vmul.f32 %v3782_v33, %v1814_v31 }
 0x3ff   : > { %v2214_v15 = vpop.xlane.xlu0 %2213  ;;  %v2371_v30 = vmul.f32 %v3790_v4, %v1815_v1 }
 0x400   : > { %2138 = vst.msk [vmem:[%s3884_s30 + $0x20] sm:$0xff] %vm2133_vm1, %v2105_v27  ;;  %v2279_v20 = vadd.f32 %v3875_v3, %v2214_v15  ;;  %1901 = vadd.xlane.f32.xlu1 %v1847_v25  ;;  %v1852_v27 = vmul.f32 %v3768_v26, %v1815_v1  ;;  %v1851_v15 = vmul.f32 %v3768_v26, %v1814_v31 }
 0x401   : > { %v2212_v36 = vpop.xlane.xlu1 %2211 }
 0x402   : > { %2312 = vst.msk [vmem:[%s3884_s30 + $0x28] sm:$0xff] %vm2306_vm2, %v2279_v20  ;;  %v2278_v37 = vadd.f32 %v3875_v3, %v2212_v36  ;;  %2076 = vadd.xlane.f32.xlu0 %v2021_v18  ;;  %v3008_v20 = vpop.f32.mrf.mxu0 }
 0x403   : > { %v2387_v10 = vpop.xlane.xlu0 %2386 }
 0x404   : > { %2311 = vst.msk [vmem:[%s3884_s30 + $0x20] sm:$0xff] %vm2306_vm2, %v2278_v37  ;;  %v2452_v35 = vadd.f32 %v3875_v3, %v2387_v10  ;;  %2074 = vadd.xlane.f32.xlu1 %v2020_v34  ;;  %v2025_v37 = vmul.f32 %v3775_v14, %v1815_v1  ;;  %v2024_v10 = vmul.f32 %v3775_v14, %v1814_v31  ;;  %v1769_v28 = vpop.f32.mrf.mxu0 }
 0x405   : > { %v2385_v58 = vpop.xlane.xlu1 %2384 }
 0x406   : > { %2485 = vst.msk [vmem:[%s3884_s30 + $0x28] sm:$0xff] %vm2479_vm3, %v2452_v35  ;;  %v2451_v40 = vadd.f32 %v3875_v3, %v2385_v58  ;;  %2249 = vadd.xlane.f32.xlu0 %v2194_v39  ;;  %v1775_v39 = vadd.f32 %v3008_v20, %v3761_v48 }
 0x407   : > { %v1872_v47 = vpop.xlane.xlu0 %1871 }
 0x408   : > { %2484 = vst.msk [vmem:[%s3884_s30 + $0x20] sm:$0xff] %vm2479_vm3, %v2451_v40  ;;  %v1935_v43 = vadd.f32 %v3875_v3, %v1872_v47  ;;  %2247 = vadd.xlane.f32.xlu1 %v2193_v41  ;;  %v1770_v41 = vadd.f32 %v3761_v48, %v1769_v28 }
 0x409   : > { %v1870_v44 = vpop.xlane.xlu1 %1869 }
 0x40a   : > { %1968 = vst.msk [vmem:[%s3884_s30 + $0x38] sm:$0xff] %vm1960_vm0, %v1935_v43  ;;  %v1934_v46 = vadd.f32 %v3875_v3, %v1870_v44  ;;  %2422 = vadd.xlane.f32.xlu0 %v2367_v45  ;;  %v1817_v45 = vmax.f32 %v1775_v39, 0.0 }
 0x40b   : > { %v2045_v51 = vpop.xlane.xlu0 %2044 }
 0x40c   : > { %1967 = vst.msk [vmem:[%s3884_s30 + $0x30] sm:$0xff] %vm1960_vm0, %v1934_v46  ;;  %v2108_v49 = vadd.f32 %v3875_v3, %v2045_v51  ;;  %2420 = vadd.xlane.f32.xlu1 %v2366_v29  ;;  %v1816_v29 = vmax.f32 %v1770_v41, 0.0  ;;  %v2200_v2 = vmul.f32 %v3782_v33, %v1817_v45 }
 0x40d   : > { %v2043_v50 = vpop.xlane.xlu1 %2042 }
 0x40e   : > { %2141 = vst.msk [vmem:[%s3884_s30 + $0x38] sm:$0xff] %vm2133_vm1, %v2108_v49  ;;  %v2107_v52 = vadd.f32 %v3875_v3, %v2043_v50  ;;  %1907 = vadd.xlane.f32.xlu0 %v1850_v19  ;;  %v2370_v49 = vmul.f32 %v3790_v4, %v1814_v31  ;;  %v2199_v1 = vmul.f32 %v3782_v33, %v1816_v29 }
 0x40f   : > { %v2218_v24 = vpop.xlane.xlu0 %2217  ;;  %v2373_v31 = vmul.f32 %v3790_v4, %v1817_v45 }
 0x410   : > { %2140 = vst.msk [vmem:[%s3884_s30 + $0x30] sm:$0xff] %vm2133_vm1, %v2107_v52  ;;  %v2281_v62 = vadd.f32 %v3875_v3, %v2218_v24  ;;  %1905 = vadd.xlane.f32.xlu1 %v1849_v56  ;;  %v1854_v52 = vmul.f32 %v3768_v26, %v1817_v45  ;;  %v1853_v24 = vmul.f32 %v3768_v26, %v1816_v29 }
 0x411   : > { %v2216_v42 = vpop.xlane.xlu1 %2215 }
 0x412   : > { %2314 = vst.msk [vmem:[%s3884_s30 + $0x38] sm:$0xff] %vm2306_vm2, %v2281_v62  ;;  %v2280_v11 = vadd.f32 %v3875_v3, %v2216_v42  ;;  %2080 = vadd.xlane.f32.xlu0 %v2023_v0  ;;  %v3011_v62 = vpop.f32.mrf.mxu0 }
 0x413   : > { %v2391_v60 = vpop.xlane.xlu0 %2390 }
 0x414   : > { %2313 = vst.msk [vmem:[%s3884_s30 + $0x30] sm:$0xff] %vm2306_vm2, %v2280_v11  ;;  %v2454_v63 = vadd.f32 %v3875_v3, %v2391_v60  ;;  %2078 = vadd.xlane.f32.xlu1 %v2022_v57  ;;  %v2027_v11 = vmul.f32 %v3775_v14, %v1817_v45  ;;  %v2026_v60 = vmul.f32 %v3775_v14, %v1816_v29  ;;  %v1779_v61 = vpop.f32.mrf.mxu0 }
 0x415   : > { %v2389_v5 = vpop.xlane.xlu1 %2388 }
 0x416   : > { %2487 = vst.msk [vmem:[%s3884_s30 + $0x38] sm:$0xff] %vm2479_vm3, %v2454_v63  ;;  %v2453_v8 = vadd.f32 %v3875_v3, %v2389_v5  ;;  %2253 = vadd.xlane.f32.xlu0 %v2196_v54  ;;  %v1785_v54 = vadd.f32 %v3011_v62, %v3761_v48 }
 0x417   : > { %v1876_v7 = vpop.xlane.xlu0 %1875 }
 0x418   : > { %2486 = vst.msk [vmem:[%s3884_s30 + $0x30] sm:$0xff] %vm2479_vm3, %v2453_v8  ;;  %v1937_v17 = vadd.f32 %v3875_v3, %v1876_v7  ;;  %2251 = vadd.xlane.f32.xlu1 %v2195_v53  ;;  %v1780_v53 = vadd.f32 %v3761_v48, %v1779_v61 }
 0x419   : > { %v1874_v16 = vpop.xlane.xlu1 %1873 }
 0x41a   : > { %1970 = vst.msk [vmem:[%s3884_s30 + $0x48] sm:$0xff] %vm1960_vm0, %v1937_v17  ;;  %v1936_v21 = vadd.f32 %v3875_v3, %v1874_v16  ;;  %2426 = vadd.xlane.f32.xlu0 %v2369_v9  ;;  %v1819_v9 = vmax.f32 %v1785_v54, 0.0  ;;  %v1818_v48 = vmax.f32 %v1780_v53, 0.0 }
 0x41b   : > { %v2049_v13 = vpop.xlane.xlu0 %2048 }
 0x41c   : > { %1969 = vst.msk [vmem:[%s3884_s30 + $0x40] sm:$0xff] %vm1960_vm0, %v1936_v21  ;;  %v2110_v22 = vadd.f32 %v3875_v3, %v2049_v13  ;;  %2424 = vadd.xlane.f32.xlu1 %v2368_v12  ;;  %v2372_v13 = vmul.f32 %v3790_v4, %v1816_v29  ;;  %v1855_v20 = vmul.f32 %v3768_v26, %v1818_v48 }
 0x41d   : > { %v2047_v25 = vpop.xlane.xlu1 %2046  ;;  %v2375_v41 = vmul.f32 %v3790_v4, %v1819_v9 }
 0x41e   : > { %2143 = vst.msk [vmem:[%s3884_s30 + $0x48] sm:$0xff] %vm2133_vm1, %v2110_v22  ;;  %v2109_v32 = vadd.f32 %v3875_v3, %v2047_v25  ;;  %1911 = vadd.xlane.f32.xlu0 %v1852_v27  ;;  %v1856_v25 = vmul.f32 %v3768_v26, %v1819_v9 }
 0x41f   : > { %v2222_v18 = vpop.xlane.xlu0 %2221 }
 0x420   : > { %2142 = vst.msk [vmem:[%s3884_s30 + $0x40] sm:$0xff] %vm2133_vm1, %v2109_v32  ;;  %v2283_v36 = vadd.f32 %v3875_v3, %v2222_v18  ;;  %1909 = vadd.xlane.f32.xlu1 %v1851_v15 }
 0x421   : > { %v2220_v34 = vpop.xlane.xlu1 %2219 }
 0x422   : > { %2316 = vst.msk [vmem:[%s3884_s30 + $0x48] sm:$0xff] %vm2306_vm2, %v2283_v36  ;;  %v2282_v38 = vadd.f32 %v3875_v3, %v2220_v34  ;;  %2084 = vadd.xlane.f32.xlu0 %v2025_v37  ;;  %v2029_v37 = vmul.f32 %v3775_v14, %v1819_v9 }
 0x423   : > { %v2395_v35 = vpop.xlane.xlu0 %2394 }
 0x424   : > { %2315 = vst.msk [vmem:[%s3884_s30 + $0x40] sm:$0xff] %vm2306_vm2, %v2282_v38  ;;  %v2456_v58 = vadd.f32 %v3875_v3, %v2395_v35  ;;  %2082 = vadd.xlane.f32.xlu1 %v2024_v10  ;;  %v2028_v10 = vmul.f32 %v3775_v14, %v1818_v48  ;;  %v2202_v35 = vmul.f32 %v3782_v33, %v1819_v9 }
 0x425   : > { %v2393_v40 = vpop.xlane.xlu1 %2392 }
 0x426   : > { %2489 = vst.msk [vmem:[%s3884_s30 + $0x48] sm:$0xff] %vm2479_vm3, %v2456_v58  ;;  %v2455_v47 = vadd.f32 %v3875_v3, %v2393_v40  ;;  %2257 = vadd.xlane.f32.xlu0 %v2198_v23  ;;  %v2201_v23 = vmul.f32 %v3782_v33, %v1818_v48  ;;  %v3107_v33 = vld [vmem:[%s4341_s5 + $0x3] ss:$0 sm:$0xff] }
 0x427   : > { %v1880_v43 = vpop.xlane.xlu0 %1879 }
 0x428   : > { %2488 = vst.msk [vmem:[%s3884_s30 + $0x40] sm:$0xff] %vm2479_vm3, %v2455_v47  ;;  %v1939_v44 = vadd.f32 %v3875_v3, %v1880_v43  ;;  %2255 = vadd.xlane.f32.xlu1 %v2197_v6  ;;  %v2374_v43 = vmul.f32 %v3107_v33, %v1818_v48 }
 0x429   : > { %v1878_v46 = vpop.xlane.xlu1 %1877 }
 0x42a   : > { %1972 = vst.msk [vmem:[%s3884_s30 + $0x58] sm:$0xff] %vm1960_vm0, %v1939_v44  ;;  %v1938_v51 = vadd.f32 %v3875_v3, %v1878_v46  ;;  %2430 = vadd.xlane.f32.xlu0 %v2371_v30 }
 0x42b   : > { %v2053_v19 = vpop.xlane.xlu0 %2052 }
 0x42c   : > { %1971 = vst.msk [vmem:[%s3884_s30 + $0x50] sm:$0xff] %vm1960_vm0, %v1938_v51  ;;  %v2112_v50 = vadd.f32 %v3875_v3, %v2053_v19  ;;  %2428 = vadd.xlane.f32.xlu1 %v2370_v49 }
 0x42d   : > { %v2051_v56 = vpop.xlane.xlu1 %2050 }
 0x42e   : > { %2145 = vst.msk [vmem:[%s3884_s30 + $0x58] sm:$0xff] %vm2133_vm1, %v2112_v50  ;;  %v2111_v55 = vadd.f32 %v3875_v3, %v2051_v56  ;;  %1915 = vadd.xlane.f32.xlu0 %v1854_v52 }
 0x42f   : > { %v2226_v0 = vpop.xlane.xlu0 %2225 }
 0x430   : > { %2144 = vst.msk [vmem:[%s3884_s30 + $0x50] sm:$0xff] %vm2133_vm1, %v2111_v55  ;;  %v2285_v42 = vadd.f32 %v3875_v3, %v2226_v0  ;;  %1913 = vadd.xlane.f32.xlu1 %v1853_v24 }
 0x431   : > { %v2224_v57 = vpop.xlane.xlu1 %2223 }
 0x432   : > { %2318 = vst.msk [vmem:[%s3884_s30 + $0x58] sm:$0xff] %vm2306_vm2, %v2285_v42  ;;  %v2284_v59 = vadd.f32 %v3875_v3, %v2224_v57  ;;  %2088 = vadd.xlane.f32.xlu0 %v2027_v11 }
 0x433   : > { %v2399_v63 = vpop.xlane.xlu0 %2398 }
 0x434   : > { %2317 = vst.msk [vmem:[%s3884_s30 + $0x50] sm:$0xff] %vm2306_vm2, %v2284_v59  ;;  %v2458_v5 = vadd.f32 %v3875_v3, %v2399_v63  ;;  %2086 = vadd.xlane.f32.xlu1 %v2026_v60 }
 0x435   : > { %v2397_v8 = vpop.xlane.xlu1 %2396 }
 0x436   : > { %2491 = vst.msk [vmem:[%s3884_s30 + $0x58] sm:$0xff] %vm2479_vm3, %v2458_v5  ;;  %v2457_v7 = vadd.f32 %v3875_v3, %v2397_v8  ;;  %2261 = vadd.xlane.f32.xlu0 %v2200_v2 }
 0x437   : > { %v1884_v17 = vpop.xlane.xlu0 %1883 }
 0x438   : > { %2490 = vst.msk [vmem:[%s3884_s30 + $0x50] sm:$0xff] %vm2479_vm3, %v2457_v7  ;;  %v1941_v16 = vadd.f32 %v3875_v3, %v1884_v17  ;;  %2259 = vadd.xlane.f32.xlu1 %v2199_v1 }
 0x439   : > { %v1882_v21 = vpop.xlane.xlu1 %1881 }
 0x43a   : > { %1974 = vst.msk [vmem:[%s3884_s30 + $0x68] sm:$0xff] %vm1960_vm0, %v1941_v16  ;;  %v1940_v12 = vadd.f32 %v3875_v3, %v1882_v21  ;;  %2434 = vadd.xlane.f32.xlu0 %v2373_v31 }
 0x43b   : > { %v2057_v22 = vpop.xlane.xlu0 %2056 }
 0x43c   : > { %1973 = vst.msk [vmem:[%s3884_s30 + $0x60] sm:$0xff] %vm1960_vm0, %v1940_v12  ;;  %v2114_v27 = vadd.f32 %v3875_v3, %v2057_v22  ;;  %2432 = vadd.xlane.f32.xlu1 %v2372_v13 }
 0x43d   : > { %v2055_v32 = vpop.xlane.xlu1 %2054 }
 0x43e   : > { %2147 = vst.msk [vmem:[%s3884_s30 + $0x68] sm:$0xff] %vm2133_vm1, %v2114_v27  ;;  %v2113_v15 = vadd.f32 %v3875_v3, %v2055_v32  ;;  %1919 = vadd.xlane.f32.xlu0 %v1856_v25 }
 0x43f   : > { %v2230_v18 = vpop.xlane.xlu0 %2229 }
 0x440   : > { %2146 = vst.msk [vmem:[%s3884_s30 + $0x60] sm:$0xff] %vm2133_vm1, %v2113_v15  ;;  %v2287_v36 = vadd.f32 %v3875_v3, %v2230_v18  ;;  %1917 = vadd.xlane.f32.xlu1 %v1855_v20 }
 0x441   : > { %v2228_v34 = vpop.xlane.xlu1 %2227 }
 0x442   : > { %2320 = vst.msk [vmem:[%s3884_s30 + $0x68] sm:$0xff] %vm2306_vm2, %v2287_v36  ;;  %v2286_v38 = vadd.f32 %v3875_v3, %v2228_v34  ;;  %2092 = vadd.xlane.f32.xlu0 %v2029_v37 }
 0x443   : > { %v2403_v28 = vpop.xlane.xlu0 %2402 }
 0x444   : > { %2319 = vst.msk [vmem:[%s3884_s30 + $0x60] sm:$0xff] %vm2306_vm2, %v2286_v38  ;;  %v2460_v26 = vadd.f32 %v3875_v3, %v2403_v28  ;;  %2090 = vadd.xlane.f32.xlu1 %v2028_v10 }
 0x445   : > { %v2401_v39 = vpop.xlane.xlu1 %2400 }
 0x446   : > { %2493 = vst.msk [vmem:[%s3884_s30 + $0x68] sm:$0xff] %vm2479_vm3, %v2460_v26  ;;  %v2459_v58 = vadd.f32 %v3875_v3, %v2401_v39  ;;  %2265 = vadd.xlane.f32.xlu0 %v2202_v35 }
 0x447   : > { %v1888_v40 = vpop.xlane.xlu0 %1887 }
 0x448   : > { %2492 = vst.msk [vmem:[%s3884_s30 + $0x60] sm:$0xff] %vm2479_vm3, %v2459_v58  ;;  %v1943_v14 = vadd.f32 %v3875_v3, %v1888_v40  ;;  %2263 = vadd.xlane.f32.xlu1 %v2201_v23 }
 0x449   : > { %v1886_v47 = vpop.xlane.xlu1 %1885 }
 0x44a   : > { %1976 = vst.msk [vmem:[%s3884_s30 + $0x78] sm:$0xff] %vm1960_vm0, %v1943_v14  ;;  %v1942_v6 = vadd.f32 %v3875_v3, %v1886_v47  ;;  %2438 = vadd.xlane.f32.xlu0 %v2375_v41 }
 0x44b   : > { %v2061_v45 = vpop.xlane.xlu0 %2060 }
 0x44c   : > { %1975 = vst.msk [vmem:[%s3884_s30 + $0x70] sm:$0xff] %vm1960_vm0, %v1942_v6  ;;  %v2116_v44 = vadd.f32 %v3875_v3, %v2061_v45  ;;  %2436 = vadd.xlane.f32.xlu1 %v2374_v43 }
 0x44d   : > { %v2059_v4 = vpop.xlane.xlu1 %2058 }
 0x44e   : > { %2149 = vst.msk [vmem:[%s3884_s30 + $0x78] sm:$0xff] %vm2133_vm1, %v2116_v44  ;;  %v2115_v30 = vadd.f32 %v3875_v3, %v2059_v4 }
 0x44f   : > { %v2234_v46 = vpop.xlane.xlu0 %2233 }
 0x450   : > { %2148 = vst.msk [vmem:[%s3884_s30 + $0x70] sm:$0xff] %vm2133_vm1, %v2115_v30  ;;  %v2289_v29 = vadd.f32 %v3875_v3, %v2234_v46 }
 0x451   : > { %v2232_v51 = vpop.xlane.xlu1 %2231 }
 0x452   : > { %2322 = vst.msk [vmem:[%s3884_s30 + $0x78] sm:$0xff] %vm2306_vm2, %v2289_v29  ;;  %v2288_v49 = vadd.f32 %v3875_v3, %v2232_v51 }
 0x453   : > { %v2407_v19 = vpop.xlane.xlu0 %2406 }
 0x454   : > { %2321 = vst.msk [vmem:[%s3884_s30 + $0x70] sm:$0xff] %vm2306_vm2, %v2288_v49  ;;  %v2462_v50 = vadd.f32 %v3875_v3, %v2407_v19 }
 0x455   : > { %v2405_v52 = vpop.xlane.xlu1 %2404 }
 0x456   : > { %2495 = vst.msk [vmem:[%s3884_s30 + $0x78] sm:$0xff] %vm2479_vm3, %v2462_v50  ;;  %v2461_v56 = vadd.f32 %v3875_v3, %v2405_v52 }
 0x457   : > { %v1892_v55 = vpop.xlane.xlu0 %1891 }
 0x458   : > { %2494 = vst.msk [vmem:[%s3884_s30 + $0x70] sm:$0xff] %vm2479_vm3, %v2461_v56  ;;  %v1945_v24 = vadd.f32 %v3875_v3, %v1892_v55 }
 0x459   : > { %v1890_v62 = vpop.xlane.xlu1 %1889 }
 0x45a   : > { %1978 = vst.msk [vmem:[%s3884_s30 + $0x88] sm:$0xff] %vm1960_vm0, %v1945_v24  ;;  %v1944_v0 = vadd.f32 %v3875_v3, %v1890_v62 }
 0x45b   : > { %v2065_v42 = vpop.xlane.xlu0 %2064 }
 0x45c   : > { %1977 = vst.msk [vmem:[%s3884_s30 + $0x80] sm:$0xff] %vm1960_vm0, %v1944_v0  ;;  %v2118_v11 = vadd.f32 %v3875_v3, %v2065_v42 }
 0x45d   : > { %v2063_v57 = vpop.xlane.xlu1 %2062 }
 0x45e   : > { %2151 = vst.msk [vmem:[%s3884_s30 + $0x88] sm:$0xff] %vm2133_vm1, %v2118_v11  ;;  %v2117_v59 = vadd.f32 %v3875_v3, %v2063_v57 }
 0x45f   : > { %v2238_v60 = vpop.xlane.xlu0 %2237 }
 0x460   : > { %2150 = vst.msk [vmem:[%s3884_s30 + $0x80] sm:$0xff] %vm2133_vm1, %v2117_v59  ;;  %v2291_v61 = vadd.f32 %v3875_v3, %v2238_v60 }
 0x461   : > { %v2236_v63 = vpop.xlane.xlu1 %2235 }
 0x462   : > { %2324 = vst.msk [vmem:[%s3884_s30 + $0x88] sm:$0xff] %vm2306_vm2, %v2291_v61  ;;  %v2290_v54 = vadd.f32 %v3875_v3, %v2236_v63 }
 0x463   : > { %v2411_v5 = vpop.xlane.xlu0 %2410 }
 0x464   : > { %2323 = vst.msk [vmem:[%s3884_s30 + $0x80] sm:$0xff] %vm2306_vm2, %v2290_v54  ;;  %v2464_v2 = vadd.f32 %v3875_v3, %v2411_v5 }
 0x465   : > { %v2409_v8 = vpop.xlane.xlu1 %2408 }
 0x466   : > { %2497 = vst.msk [vmem:[%s3884_s30 + $0x88] sm:$0xff] %vm2479_vm3, %v2464_v2  ;;  %v2463_v53 = vadd.f32 %v3875_v3, %v2409_v8 }
 0x467   : > { %v1896_v7 = vpop.xlane.xlu0 %1895 }
 0x468   : > { %2496 = vst.msk [vmem:[%s3884_s30 + $0x80] sm:$0xff] %vm2479_vm3, %v2463_v53  ;;  %v1947_v1 = vadd.f32 %v3875_v3, %v1896_v7 }
 0x469   : > { %v1894_v17 = vpop.xlane.xlu1 %1893 }
 0x46a   : > { %1980 = vst.msk [vmem:[%s3884_s30 + $0x98] sm:$0xff] %vm1960_vm0, %v1947_v1  ;;  %v1946_v9 = vadd.f32 %v3875_v3, %v1894_v17 }
 0x46b   : > { %v2069_v16 = vpop.xlane.xlu0 %2068 }
 0x46c   : > { %1979 = vst.msk [vmem:[%s3884_s30 + $0x90] sm:$0xff] %vm1960_vm0, %v1946_v9  ;;  %v2120_v31 = vadd.f32 %v3875_v3, %v2069_v16 }
 0x46d   : > { %v2067_v21 = vpop.xlane.xlu1 %2066 }
 0x46e   : > { %2153 = vst.msk [vmem:[%s3884_s30 + $0x98] sm:$0xff] %vm2133_vm1, %v2120_v31  ;;  %v2119_v48 = vadd.f32 %v3875_v3, %v2067_v21 }
 0x46f   : > { %v2242_v12 = vpop.xlane.xlu0 %2241 }
 0x470   : > { %2152 = vst.msk [vmem:[%s3884_s30 + $0x90] sm:$0xff] %vm2133_vm1, %v2119_v48  ;;  %v2293_v13 = vadd.f32 %v3875_v3, %v2242_v12 }
 0x471   : > { %v2240_v22 = vpop.xlane.xlu1 %2239 }
 0x472   : > { %2326 = vst.msk [vmem:[%s3884_s30 + $0x98] sm:$0xff] %vm2306_vm2, %v2293_v13  ;;  %v2292_v27 = vadd.f32 %v3875_v3, %v2240_v22 }
 0x473   : > { %v2415_v25 = vpop.xlane.xlu0 %2414 }
 0x474   : > { %2325 = vst.msk [vmem:[%s3884_s30 + $0x90] sm:$0xff] %vm2306_vm2, %v2292_v27  ;;  %v2466_v32 = vadd.f32 %v3875_v3, %v2415_v25 }
 0x475   : > { %v2413_v15 = vpop.xlane.xlu1 %2412 }
 0x476   : > { %2499 = vst.msk [vmem:[%s3884_s30 + $0x98] sm:$0xff] %vm2479_vm3, %v2466_v32  ;;  %v2465_v20 = vadd.f32 %v3875_v3, %v2413_v15 }
 0x477   : > { %v1900_v18 = vpop.xlane.xlu0 %1899 }
 0x478   : > { %2498 = vst.msk [vmem:[%s3884_s30 + $0x90] sm:$0xff] %vm2479_vm3, %v2465_v20  ;;  %v1949_v36 = vadd.f32 %v3875_v3, %v1900_v18 }
 0x479   : > { %v1898_v37 = vpop.xlane.xlu1 %1897 }
 0x47a   : > { %1982 = vst.msk [vmem:[%s3884_s30 + $0xa8] sm:$0xff] %vm1960_vm0, %v1949_v36  ;;  %v1948_v34 = vadd.f32 %v3875_v3, %v1898_v37 }
 0x47b   : > { %v2073_v38 = vpop.xlane.xlu0 %2072 }
 0x47c   : > { %1981 = vst.msk [vmem:[%s3884_s30 + $0xa0] sm:$0xff] %vm1960_vm0, %v1948_v34  ;;  %v2122_v10 = vadd.f32 %v3875_v3, %v2073_v38 }
 0x47d   : > { %v2071_v28 = vpop.xlane.xlu1 %2070 }
 0x47e   : > { %2155 = vst.msk [vmem:[%s3884_s30 + $0xa8] sm:$0xff] %vm2133_vm1, %v2122_v10  ;;  %v2121_v26 = vadd.f32 %v3875_v3, %v2071_v28 }
 0x47f   : > { %v2246_v35 = vpop.xlane.xlu0 %2245 }
 0x480   : > { %2154 = vst.msk [vmem:[%s3884_s30 + $0xa0] sm:$0xff] %vm2133_vm1, %v2121_v26  ;;  %v2295_v39 = vadd.f32 %v3875_v3, %v2246_v35 }
 0x481   : > { %v2244_v58 = vpop.xlane.xlu1 %2243 }
 0x482   : > { %2328 = vst.msk [vmem:[%s3884_s30 + $0xa8] sm:$0xff] %vm2306_vm2, %v2295_v39  ;;  %v2294_v23 = vadd.f32 %v3875_v3, %v2244_v58  ;;  %v3108_v58 = vld [vmem:[%s4342_s6] ss:$0 sm:$0xff] }
 0x483   : > { %v2419_v40 = vpop.xlane.xlu0 %2418 }
 0x484   : > { %2327 = vst.msk [vmem:[%s3884_s30 + $0xa0] sm:$0xff] %vm2306_vm2, %v2294_v23  ;;  %v2468_v14 = vadd.f32 %v3875_v3, %v2419_v40 }
 0x485   : > { %v2417_v41 = vpop.xlane.xlu1 %2416 }
 0x486   : > { %2501 = vst.msk [vmem:[%s3884_s30 + $0xa8] sm:$0xff] %vm2479_vm3, %v2468_v14  ;;  %v2467_v47 = vadd.f32 %v3875_v3, %v2417_v41 }
 0x487   : > { %v1904_v6 = vpop.xlane.xlu0 %1903 }
 0x488   : > { %2500 = vst.msk [vmem:[%s3884_s30 + $0xa0] sm:$0xff] %vm2479_vm3, %v2467_v47  ;;  %v1951_v33 = vadd.f32 %v3875_v3, %v1904_v6 }
 0x489   : > { %v1902_v43 = vpop.xlane.xlu1 %1901 }
 0x48a   : > { %1984 = vst.msk [vmem:[%s3884_s30 + $0xb8] sm:$0xff] %vm1960_vm0, %v1951_v33  ;;  %v1950_v45 = vadd.f32 %v3875_v3, %v1902_v43 }
 0x48b   : > { %v2077_v44 = vpop.xlane.xlu0 %2076 }
 0x48c   : > { %1983 = vst.msk [vmem:[%s3884_s30 + $0xb0] sm:$0xff] %vm1960_vm0, %v1950_v45  ;;  %v2124_v4 = vadd.f32 %v3875_v3, %v2077_v44 }
 0x48d   : > { %v2075_v30 = vpop.xlane.xlu1 %2074 }
 0x48e   : > { %2157 = vst.msk [vmem:[%s3884_s30 + $0xb8] sm:$0xff] %vm2133_vm1, %v2124_v4  ;;  %v2123_v46 = vadd.f32 %v3875_v3, %v2075_v30 }
 0x48f   : > { %v2250_v29 = vpop.xlane.xlu0 %2249 }
 0x490   : > { %2156 = vst.msk [vmem:[%s3884_s30 + $0xb0] sm:$0xff] %vm2133_vm1, %v2123_v46  ;;  %v2297_v51 = vadd.f32 %v3875_v3, %v2250_v29 }
 0x491   : > { %v2248_v49 = vpop.xlane.xlu1 %2247 }
 0x492   : > { %2330 = vst.msk [vmem:[%s3884_s30 + $0xb8] sm:$0xff] %vm2306_vm2, %v2297_v51  ;;  %v2296_v19 = vadd.f32 %v3875_v3, %v2248_v49 }
 0x493   : > { %v2423_v50 = vpop.xlane.xlu0 %2422 }
 0x494   : > { %2329 = vst.msk [vmem:[%s3884_s30 + $0xb0] sm:$0xff] %vm2306_vm2, %v2296_v19  ;;  %v2470_v52 = vadd.f32 %v3875_v3, %v2423_v50 }
 0x495   : > { %v2421_v56 = vpop.xlane.xlu1 %2420 }
 0x496   : > { %2503 = vst.msk [vmem:[%s3884_s30 + $0xb8] sm:$0xff] %vm2479_vm3, %v2470_v52  ;;  %v2469_v55 = vadd.f32 %v3875_v3, %v2421_v56 }
 0x497   : > { %v1908_v24 = vpop.xlane.xlu0 %1907 }
 0x498   : > { %2502 = vst.msk [vmem:[%s3884_s30 + $0xb0] sm:$0xff] %vm2479_vm3, %v2469_v55  ;;  %v1953_v62 = vadd.f32 %v3875_v3, %v1908_v24 }
 0x499   : > { %v1906_v0 = vpop.xlane.xlu1 %1905 }
 0x49a   : > { %1986 = vst.msk [vmem:[%s3884_s30 + $0xc8] sm:$0xff] %vm1960_vm0, %v1953_v62  ;;  %v1952_v42 = vadd.f32 %v3875_v3, %v1906_v0 }
 0x49b   : > { %v2081_v11 = vpop.xlane.xlu0 %2080 }
 0x49c   : > { %1985 = vst.msk [vmem:[%s3884_s30 + $0xc0] sm:$0xff] %vm1960_vm0, %v1952_v42  ;;  %v2126_v57 = vadd.f32 %v3875_v3, %v2081_v11 }
 0x49d   : > { %v2079_v59 = vpop.xlane.xlu1 %2078 }
 0x49e   : > { %2159 = vst.msk [vmem:[%s3884_s30 + $0xc8] sm:$0xff] %vm2133_vm1, %v2126_v57  ;;  %v2125_v60 = vadd.f32 %v3875_v3, %v2079_v59 }
 0x49f   : > { %v2254_v61 = vpop.xlane.xlu0 %2253 }
 0x4a0   : > { %2158 = vst.msk [vmem:[%s3884_s30 + $0xc0] sm:$0xff] %vm2133_vm1, %v2125_v60  ;;  %v2299_v63 = vadd.f32 %v3875_v3, %v2254_v61 }
 0x4a1   : > { %v2252_v54 = vpop.xlane.xlu1 %2251 }
 0x4a2   : > { %2332 = vst.msk [vmem:[%s3884_s30 + $0xc8] sm:$0xff] %vm2306_vm2, %v2299_v63  ;;  %v2298_v5 = vadd.f32 %v3875_v3, %v2252_v54 }
 0x4a3   : > { %v2427_v2 = vpop.xlane.xlu0 %2426 }
 0x4a4   : > { %2331 = vst.msk [vmem:[%s3884_s30 + $0xc0] sm:$0xff] %vm2306_vm2, %v2298_v5  ;;  %v2472_v8 = vadd.f32 %v3875_v3, %v2427_v2 }
 0x4a5   : > { %v2425_v53 = vpop.xlane.xlu1 %2424 }
 0x4a6   : > { %2505 = vst.msk [vmem:[%s3884_s30 + $0xc8] sm:$0xff] %vm2479_vm3, %v2472_v8  ;;  %v2471_v7 = vadd.f32 %v3875_v3, %v2425_v53 }
 0x4a7   : > { %v1912_v1 = vpop.xlane.xlu0 %1911 }
 0x4a8   : > { %2504 = vst.msk [vmem:[%s3884_s30 + $0xc0] sm:$0xff] %vm2479_vm3, %v2471_v7  ;;  %v1955_v17 = vadd.f32 %v3875_v3, %v1912_v1 }
 0x4a9   : > { %v1910_v9 = vpop.xlane.xlu1 %1909 }
 0x4aa   : > { %1988 = vst.msk [vmem:[%s3884_s30 + $0xd8] sm:$0xff] %vm1960_vm0, %v1955_v17  ;;  %v1954_v16 = vadd.f32 %v3875_v3, %v1910_v9 }
 0x4ab   : > { %v2085_v31 = vpop.xlane.xlu0 %2084 }
 0x4ac   : > { %1987 = vst.msk [vmem:[%s3884_s30 + $0xd0] sm:$0xff] %vm1960_vm0, %v1954_v16  ;;  %v2128_v21 = vadd.f32 %v3875_v3, %v2085_v31 }
 0x4ad   : > { %v2083_v48 = vpop.xlane.xlu1 %2082 }
 0x4ae   : > { %2161 = vst.msk [vmem:[%s3884_s30 + $0xd8] sm:$0xff] %vm2133_vm1, %v2128_v21  ;;  %v2127_v12 = vadd.f32 %v3875_v3, %v2083_v48 }
 0x4af   : > { %v2258_v13 = vpop.xlane.xlu0 %2257 }
 0x4b0   : > { %2160 = vst.msk [vmem:[%s3884_s30 + $0xd0] sm:$0xff] %vm2133_vm1, %v2127_v12  ;;  %v2301_v22 = vadd.f32 %v3875_v3, %v2258_v13 }
 0x4b1   : > { %v2256_v27 = vpop.xlane.xlu1 %2255 }
 0x4b2   : > { %2334 = vst.msk [vmem:[%s3884_s30 + $0xd8] sm:$0xff] %vm2306_vm2, %v2301_v22  ;;  %v2300_v25 = vadd.f32 %v3875_v3, %v2256_v27 }
 0x4b3   : > { %v2431_v32 = vpop.xlane.xlu0 %2430 }
 0x4b4   : > { %2333 = vst.msk [vmem:[%s3884_s30 + $0xd0] sm:$0xff] %vm2306_vm2, %v2300_v25  ;;  %v2474_v15 = vadd.f32 %v3875_v3, %v2431_v32 }
 0x4b5   : > { %v2429_v20 = vpop.xlane.xlu1 %2428 }
 0x4b6   : > { %2507 = vst.msk [vmem:[%s3884_s30 + $0xd8] sm:$0xff] %vm2479_vm3, %v2474_v15  ;;  %v2473_v18 = vadd.f32 %v3875_v3, %v2429_v20 }
 0x4b7   : > { %v1916_v36 = vpop.xlane.xlu0 %1915 }
 0x4b8   : > { %2506 = vst.msk [vmem:[%s3884_s30 + $0xd0] sm:$0xff] %vm2479_vm3, %v2473_v18  ;;  %v1957_v37 = vadd.f32 %v3875_v3, %v1916_v36 }
 0x4b9   : > { %v1914_v34 = vpop.xlane.xlu1 %1913 }
 0x4ba   : > { %1990 = vst.msk [vmem:[%s3884_s30 + $0xe8] sm:$0xff] %vm1960_vm0, %v1957_v37  ;;  %v1956_v38 = vadd.f32 %v3875_v3, %v1914_v34 }
 0x4bb   : > { %v2089_v10 = vpop.xlane.xlu0 %2088 }
 0x4bc   : > { %1989 = vst.msk [vmem:[%s3884_s30 + $0xe0] sm:$0xff] %vm1960_vm0, %v1956_v38  ;;  %v2130_v28 = vadd.f32 %v3875_v3, %v2089_v10 }
 0x4bd   : > { %v2087_v26 = vpop.xlane.xlu1 %2086 }
 0x4be   : > { %2163 = vst.msk [vmem:[%s3884_s30 + $0xe8] sm:$0xff] %vm2133_vm1, %v2130_v28  ;;  %v2129_v35 = vadd.f32 %v3875_v3, %v2087_v26 }
 0x4bf   : > { %v2262_v39 = vpop.xlane.xlu0 %2261 }
 0x4c0   : > { %2162 = vst.msk [vmem:[%s3884_s30 + $0xe0] sm:$0xff] %vm2133_vm1, %v2129_v35  ;;  %v2303_v23 = vadd.f32 %v3108_v58, %v2262_v39 }
 0x4c1   : > { %v2260_v40 = vpop.xlane.xlu1 %2259 }
 0x4c2   : > { %2336 = vst.msk [vmem:[%s3884_s30 + $0xe8] sm:$0xff] %vm2306_vm2, %v2303_v23  ;;  %v2302_v14 = vadd.f32 %v3108_v58, %v2260_v40 }
 0x4c3   : > { %v2435_v41 = vpop.xlane.xlu0 %2434 }
 0x4c4   : > { %2335 = vst.msk [vmem:[%s3884_s30 + $0xe0] sm:$0xff] %vm2306_vm2, %v2302_v14  ;;  %v2476_v47 = vadd.f32 %v3108_v58, %v2435_v41 }
 0x4c5   : > { %v2433_v3 = vpop.xlane.xlu1 %2432 }
 0x4c6   : > { %2509 = vst.msk [vmem:[%s3884_s30 + $0xe8] sm:$0xff] %vm2479_vm3, %v2476_v47  ;;  %v2475_v6 = vadd.f32 %v3108_v58, %v2433_v3 }
 0x4c7   : > { %v1920_v33 = vpop.xlane.xlu0 %1919 }
 0x4c8   : > { %2508 = vst.msk [vmem:[%s3884_s30 + $0xe0] sm:$0xff] %vm2479_vm3, %v2475_v6  ;;  %v1959_v43 = vadd.f32 %v3108_v58, %v1920_v33 }
 0x4c9   : > { %v1918_v45 = vpop.xlane.xlu1 %1917 }
 0x4ca   : > { %1992 = vst.msk [vmem:[%s3884_s30 + $0xf8] sm:$0xff] %vm1960_vm0, %v1959_v43  ;;  %v1958_v44 = vadd.f32 %v3108_v58, %v1918_v45 }
 0x4cb   : > { %v2093_v4 = vpop.xlane.xlu0 %2092 }
 0x4cc   : > { %1991 = vst.msk [vmem:[%s3884_s30 + $0xf0] sm:$0xff] %vm1960_vm0, %v1958_v44  ;;  %v2132_v30 = vadd.f32 %v3108_v58, %v2093_v4 }
 0x4cd   : > { %v2091_v46 = vpop.xlane.xlu1 %2090 }
 0x4ce   : > { %2165 = vst.msk [vmem:[%s3884_s30 + $0xf8] sm:$0xff] %vm2133_vm1, %v2132_v30  ;;  %v2131_v29 = vadd.f32 %v3108_v58, %v2091_v46 }
 0x4cf   : > { %v2266_v51 = vpop.xlane.xlu0 %2265 }
 0x4d0   : > { %2164 = vst.msk [vmem:[%s3884_s30 + $0xf0] sm:$0xff] %vm2133_vm1, %v2131_v29  ;;  %v2305_v49 = vadd.f32 %v3108_v58, %v2266_v51 }
 0x4d1   : > { %v2264_v19 = vpop.xlane.xlu1 %2263 }
 0x4d2   : > { %2338 = vst.msk [vmem:[%s3884_s30 + $0xf8] sm:$0xff] %vm2306_vm2, %v2305_v49  ;;  %v2304_v50 = vadd.f32 %v3108_v58, %v2264_v19 }
 0x4d3   : > { %v2439_v52 = vpop.xlane.xlu0 %2438 }
 0x4d4   : > { %2337 = vst.msk [vmem:[%s3884_s30 + $0xf0] sm:$0xff] %vm2306_vm2, %v2304_v50  ;;  %v2478_v56 = vadd.f32 %v3108_v58, %v2439_v52 }
 0x4d5   : > { %v2437_v55 = vpop.xlane.xlu1 %2436 }
 0x4d6   : > { %2511 = vst.msk [vmem:[%s3884_s30 + $0xf8] sm:$0xff] %vm2479_vm3, %v2478_v56  ;;  %v2477_v24 = vadd.f32 %v3108_v58, %v2437_v55 }
 0x4d8   : > { %2510 = vst.msk [vmem:[%s3884_s30 + $0xf0] sm:$0xff] %vm2479_vm3, %v2477_v24 }
 0x4d9 PF: > { %s17_s24 = sadd.s32 1, %s3115_s24  }
 0x4da   : > { %p14_p4 = scmp.ge.s32.totalorder %s17_s24, 4  }
 0x4dc   :  { %16 = sbr.rel (!%p14_p4) target bundleno = 1 (0x1), region = 82 }

</bundles_post_ra>
